<compile_context>
chip_gen: v5e
topology: v5e:2x2
jax: 0.10.0
libtpu: 0.0.40
codegen_flags: <defaults>
</compile_context>

<pallas_src>
import jax
import jax.numpy as jnp
from jax.experimental import pallas as pl
from jax.experimental.pallas import tpu as pltpu


def _scale_shift_kernel(scale_ref, shift_ref, x_ref, o_ref):
    # scale_ref / shift_ref are (1, 1) f32 scalars living in SMEM.
    sigma = scale_ref[0, 0]
    mu = shift_ref[0, 0]
    y = x_ref[...].astype(jnp.float32) * sigma + mu
    o_ref[...] = y.astype(o_ref.dtype)


def scale_shift(
    x,
    mean,
    stddev,
    *,
    max_block_bytes=6 * 1024 * 1024,
    small_bytes_threshold=1 * 1024 * 1024,
    donate_x=False,
):
    """y = x * stddev + mean, elementwise on TPU via Pallas.

    x: any-rank float array; mean / stddev: scalar arrays (buffer semantics).
    """
    orig_shape = x.shape
    orig_dtype = x.dtype
    itemsize = jnp.dtype(orig_dtype).itemsize

    sigma = jnp.asarray(stddev, dtype=jnp.float32)
    mu = jnp.asarray(mean, dtype=jnp.float32)

    n = x.size
    total_bytes = n * itemsize

    # Fast path: empty / tiny tensors (a custom call is fixed overhead and an
    # XLA fusion barrier) and non-scalar stats (let XLA broadcast handle it).
    if n == 0 or total_bytes < small_bytes_threshold or sigma.size != 1 or mu.size != 1:
        y = x.astype(jnp.float32) * sigma + mu
        return y.astype(orig_dtype)

    # ---- Build a lane-dense 2-D view without changing the lane axis unless
    # ---- strictly necessary (avoids HBM relayout copies around the kernel).
    last = orig_shape[-1] if x.ndim >= 1 else 1
    if x.ndim >= 2 and last % 128 == 0:
        # Trailing dim already lane-aligned: collapse leading dims only.
        rows, lanes = n // last, last
    else:
        # Trailing dim <128 or non-multiple: re-factor the lane axis so stores
        # are full-width vst instead of masked vst.msk (accept one relayout).
        rows = lanes = None
        for c in (512, 256, 128):
            if n % c == 0:
                rows, lanes = n // c, c
                break
        if lanes is None:
            # Ragged flat element count: keep the native trailing dim.
            if x.ndim >= 2:
                rows, lanes = n // last, last
            else:
                rows, lanes = 1, n
    x2d = x.reshape(rows, lanes)

    # ---- Row tiling: ~max_block_bytes blocks, >= 2 grid steps, sublane-packed.
    sublane_min = max(8, 32 // max(1, itemsize))  # 8 f32, 16 bf16, 32 int8/fp8
    row_bytes = lanes * itemsize

    row_tile = max(1, max_block_bytes // row_bytes)
    # Guarantee at least 2 grid steps so both v7x TensorCores get work.
    row_tile = min(row_tile, pl.cdiv(rows, 2))
    row_tile = max(sublane_min, (row_tile // sublane_min) * sublane_min)
    if row_tile >= rows:
        row_tile = rows  # full-extent block (always legal)
    grid = (pl.cdiv(rows, row_tile),)

    scale2d = sigma.reshape(1, 1)
    shift2d = mu.reshape(1, 1)

    out = pl.pallas_call(
        _scale_shift_kernel,
        out_shape=jax.ShapeDtypeStruct((rows, lanes), orig_dtype),
        grid_spec=pl.GridSpec(
            grid=grid,
            in_specs=[
                pl.BlockSpec(memory_space=pltpu.SMEM),  # stddev (sigma)
                pl.BlockSpec(memory_space=pltpu.SMEM),  # mean (mu)
                pl.BlockSpec((row_tile, lanes), lambda i: (i, 0)),
            ],
            out_specs=pl.BlockSpec((row_tile, lanes), lambda i: (i, 0)),
        ),
        compiler_params=pltpu.CompilerParams(
            dimension_semantics=("parallel",),
            # 32 MiB is the safe scoped-VMEM ceiling across v5e/v6e/v7x (v7x has
            # only 64 MiB physical per TC). In+out double-buffering = 4x block
            # <= 24 MiB with 6 MiB blocks.
            # TODO(synk): gate to ~64 MiB on v5e/v6e via pltpu.get_tpu_info()
            # for marginally larger blocks (<5% expected, so not done here).
            vmem_limit_bytes=32 * 1024 * 1024,
        ),
        input_output_aliases=({2: 0} if donate_x else {}),
    )(scale2d, shift2d, x2d)

    return out.reshape(orig_shape)


if __name__ == "__main__":
    key = jax.random.PRNGKey(0)
    ks = jax.random.split(key, 3)

    # Deterministic "buffers" (dataset statistics in schnetpack).
    mean = jnp.array(0.5, dtype=jnp.float32)
    stddev = jnp.array(2.0, dtype=jnp.float32)

    def ref(x):
        return (x.astype(jnp.float32) * stddev + mean).astype(x.dtype)

    # 1) Tiny schnetpack atomwise shape [batch, atoms, features]
    #    -> plain-JAX fast path (custom call would be pure overhead here).
    x_small = jax.random.normal(ks[0], (2, 8, 32), dtype=jnp.float32)
    y_small = jax.block_until_ready(scale_shift(x_small, mean, stddev))
    assert y_small.shape == x_small.shape and y_small.dtype == x_small.dtype
    assert jnp.allclose(y_small, ref(x_small), atol=1e-6, rtol=1e-6)

    # 2) f32, trailing dim multiple of 128 -> leading-dim collapse (no lane
    #    change), exactly 2 parallel grid steps, full-width stores.
    x_f32 = jax.random.normal(ks[1], (48, 37, 256), dtype=jnp.float32)
    y_f32 = jax.block_until_ready(scale_shift(x_f32, mean, stddev))
    assert y_f32.shape == x_f32.shape and y_f32.dtype == x_f32.dtype
    assert jnp.allclose(y_f32, ref(x_f32), atol=1e-6, rtol=1e-6)

    # 3) bf16, trailing dim not a multiple of 128 + ragged rows % row_tile != 0
    #    -> lane-axis refactor path + masked boundary block.
    x_bf16 = jax.random.normal(ks[2], (1000, 33, 64), dtype=jnp.float32).astype(
        jnp.bfloat16
    )
    y_bf16 = jax.block_until_ready(scale_shift(x_bf16, mean, stddev))
    assert y_bf16.shape == x_bf16.shape and y_bf16.dtype == jnp.bfloat16
    assert jnp.allclose(
        y_bf16.astype(jnp.float32),
        ref(x_bf16).astype(jnp.float32),
        atol=2e-2,
        rtol=2e-2,
    )

    print("KERNEL_OK")
</pallas_src>

<mosaic_0001>
module attributes {stable_mosaic.version = 11 : i64} {
  func.func @_scale_shift_kernel(%arg0: i32, %arg1: memref<1x1xf32, #tpu.memory_space<smem>>, %arg2: memref<1x1xf32, #tpu.memory_space<smem>>, %arg3: memref<888x256xf32, #tpu.memory_space<vmem>>, %arg4: memref<888x256xf32, #tpu.memory_space<vmem>>) attributes {dimension_semantics = [#tpu.dimension_semantics<parallel>], iteration_bounds = array<i64: 2>, scalar_prefetch = 0 : i64, scratch_operands = 0 : i64, tpu.core_type = #tpu.core_type<tc>, window_params = [{transform_indices = @transform_0, window_bounds = array<i64: 1, 1>}, {transform_indices = @transform_1, window_bounds = array<i64: 1, 1>}, {transform_indices = @transform_2, window_bounds = array<i64: 888, 256>}, {transform_indices = @transform_3, window_bounds = array<i64: 888, 256>}]} {
    %c0 = arith.constant 0 : index
    %c0_0 = arith.constant 0 : index
    %0 = memref.load %arg1[%c0, %c0_0] : memref<1x1xf32, #tpu.memory_space<smem>>
    %c0_1 = arith.constant 0 : index
    %c0_2 = arith.constant 0 : index
    %1 = memref.load %arg2[%c0_1, %c0_2] : memref<1x1xf32, #tpu.memory_space<smem>>
    %c0_3 = arith.constant 0 : index
    %c0_4 = arith.constant 0 : index
    %2 = vector.load %arg3[%c0_3, %c0_4] : memref<888x256xf32, #tpu.memory_space<vmem>>, vector<888x256xf32>
    %3 = vector.broadcast %0 : f32 to vector<888x256xf32>
    %4 = arith.mulf %2, %3 : vector<888x256xf32>
    %5 = vector.broadcast %1 : f32 to vector<888x256xf32>
    %6 = arith.addf %4, %5 : vector<888x256xf32>
    %c0_5 = arith.constant 0 : index
    %c0_6 = arith.constant 0 : index
    %7 = vector.load %arg4[%c0_5, %c0_6] : memref<888x256xf32, #tpu.memory_space<vmem>>, vector<888x256xf32>
    tpu.vector_store %arg4[%c0_5, %c0_6], %6 {strides = array<i32>} : memref<888x256xf32, #tpu.memory_space<vmem>>, vector<888x256xf32>,
    return
  }
  func.func @transform_0(%arg0: i32) -> (i32, i32) {
    %c0_i32 = arith.constant 0 : i32
    %c0_i32_0 = arith.constant 0 : i32
    %c0_i32_1 = arith.constant 0 : i32
    return %c0_i32, %c0_i32_0 : i32, i32
  }
  func.func @transform_1(%arg0: i32) -> (i32, i32) {
    %c0_i32 = arith.constant 0 : i32
    %c0_i32_0 = arith.constant 0 : i32
    %c0_i32_1 = arith.constant 0 : i32
    return %c0_i32, %c0_i32_0 : i32, i32
  }
  func.func @transform_2(%arg0: i32) -> (i32, i32) {
    %c0_i32 = arith.constant 0 : i32
    %c0_i32_0 = arith.constant 0 : i32
    return %arg0, %c0_i32 : i32, i32
  }
  func.func @transform_3(%arg0: i32) -> (i32, i32) {
    %c0_i32 = arith.constant 0 : i32
    %c0_i32_0 = arith.constant 0 : i32
    return %arg0, %c0_i32 : i32, i32
  }
}

</mosaic_0001>

<bundles_post_ra>
// kernel: tpu_custom_call.1
= control target key start
LH: loop header
LB: loop body
LE: loop exit
PB: predicated region body
PF: predicated region fallthrough
CT: control target
= control target key end

     0   :  { %s2392_s0 = inlined_call_operand.<no memory space> [shape: f32[1,1], index: 0, kind: input, shape index: {}]   ;;  %s2393_s1 = inlined_call_operand.<no memory space> [shape: f32[1,1], index: 1, kind: input, shape index: {}]   ;;  %s2394_s2 = inlined_call_operand.hbm [shape: f32[1776,256], index: 2, kind: input, shape index: {}]   ;;  %s2395_s3 = inlined_call_operand.hbm [shape: f32[1776,256], index: 3, kind: output, shape index: {}]  }
   0x1   :  { %8 = sst [smem:[#allocation2]] %s2392_s0 }
   0x2   :  { %9 = sst [smem:[#allocation3]] %s2393_s1 }
   0x3   :  { %10 = vsyncpa [#allocation5], 0 }
   0x4   :  { %12 = vsyncpa [#allocation5 + $0x1], 0 }
   0x5   :  { %13 = vsyncpa [#allocation6], 0 }
   0x6   :  { %15 = vsyncpa [#allocation6 + $0x1], 0  ;;  %s1374_s16 = smov 0   ;;  %s1376_s17 = smov 0  }
   0x7   :  { %s1378_s18 = smov 0   ;;  %s1380_s19 = smov 0  }
   0x8 LB: > { %s1395_s0 = sadd.s32 4294967295, %s1342_s19   ;;  %s1178_s1 = sadd.s32 4294967294, %s1342_s19   ;;  %s1342_s19 = sphi %s1380_s19, %s2403_s19   ;;  %s1338_s18 = sphi %s1378_s18, %s2402_s18   ;;  %s1334_s17 = sphi %s1376_s17, %s2401_s17   ;;  %s1330_s16 = sphi %s1374_s16, %s2400_s16  }
   0x9   : > { %s1399_s20 = sadd.s32 1, %s1342_s19   ;;  %s70_s21 = sadd.s32 1, %s1338_s18 }
   0xa   : > { %s67_s22 = ssub.s32 %s1342_s19, %s1399_s20  ;;  %p77_p0 = scmp.ne.s32.totalorder %s1338_s18, %s1334_s17 }
   0xb   : > { %p68_p1 = scmp.eq.s32.totalorder %s67_s22, 0  ;;  %p78_p2 = scmp.eq.s32.totalorder %s1342_s19, 0 }
   0xc   : > { %p83_p3 = scmp.ne.s32.totalorder %s1334_s17, %s1330_s16  ;;  %p84_p4 = scmp.eq.s32.totalorder %s1395_s0, 0 }
   0xd   : > { %s1411_s23 = scalar_select %p68_p1, %s1338_s18, %s70_s21  }
   0xe   : > { %p79_p5 = por %p78_p2, %p77_p0  ;;  %p1413_p6 = por %p84_p4, %p83_p3 }
   0xf   : > { %p107_p7 = scmp.eq.s32.totalorder %s1395_s0, 1  ;;  %p113_p8 = scmp.eq.s32.totalorder %s1178_s1, 1 }
  0x10   : > { %p1180_p9 = scmp.ge.s32.totalorder %s1342_s19, 2  ;;  %p1208_p10 = scmp.lt.s32.totalorder %s1342_s19, 2 }
  0x11   : > { %p1420_p11 = por %p107_p7, %p77_p0  ;;  %p1424_p12 = por %p113_p8, %p83_p3 }
  0x12   : > { %s139_s27 = sand.u32 1, %s1338_s18   ;;  %s1192_s28 = smul.u32 1776, %s1342_s19 }
  0x13   : > { %s1194_s29 = smul.u32 1776, %s139_s27  ;;  %p1433_p13 = pnand %p1208_p10, %p79_p5 }
  0x14   : > { %s149_s5 = scalar_lea.hbm %s2394_s2, %s1192_s28  ;;  %s140_s10 = scalar_lea.sflag [#allocation5], %s139_s27 }
  0x15   : > { %s150_s7 = sshll.u32 %s149_s5, 4  ;;  %s143_s8 = scalar_lea.vmem [#allocation4], %s1194_s29  ;;  %s151_s7 = int_to_ptr.hbm [resolvable:$true] %s150_s7 }
  0x16   : > { %s152_s9 = sshll.u32 %s143_s8, 4  ;;  %s1246_s11 = sshra.s32 %s151_s7, 4  ;;  %s153_s9 = int_to_ptr.vmem [resolvable:$true] %s152_s9  ;;  %s1247_s11 = int_to_ptr.hbm [resolvable:$true] %s1246_s11 }
  0x17   : > { %s1248_s12 = scalar_lea.hbm %s1247_s11, 1776  ;;  %p1250_p1 = pneg %p1433_p13 }
  0x18   : > { %p1249_p0 = scmp.ne.s32.totalorder %s1247_s11, %s1248_s12  ;;  %s1253_s15 = scalar_lea.hbm %s2394_s2, 3552 }
  0x19   : > { %p1254_p4 = scmp.lt.s32.totalorder %s1247_s11, %s2394_s2  ;;  %p1255_p5 = scmp.lt.s32.totalorder %s1253_s15, %s1248_s12 }
  0x1a   : > { %p1251_p2 = pnand %p1250_p1, %p1249_p0 }
  0x1b   : > { %p1256_p7 = por %p1255_p5, %p1254_p4 }
  0x1c   : > { %p1252_p3 = pneg %p1251_p2 }
  0x1e   : > { %p1257_p8 = pnand %p1256_p7, %p1252_p3 }
  0x20   : > { %1260 = shalt.err (!%p1257_p8)
}
  0x21   : > { %s1344_s22 = smov 256   ;;  %s1345_s27 = smov 16  }
  0x22   : > { %1203 = dma.hbm_to_vmem [thread:$0]  (!%p1433_p13), %s151_s7, 28416, %s153_s9, %s140_s10, %s1344_s22, %s1344_s22, %s1345_s27  }
  0x23   : > { %p1183_p10 = scmp.ge.s32.totalorder %s1342_s19, 1  ;;  %p160_p0 = scmp.lt.s32.totalorder %s1342_s19, 3 }
  0x25   : > { %p161_p1 = pnand %p1183_p10, %p160_p0 }
  0x26   : > { %s1450_s28 = sand.u32 (!%p161_p1), 1, %s1334_s17  }
  0x27   : > { %164 = sbr.rel (%p161_p1) target bundleno = 281 (0x119), region = 32  ;;  %s167_s30 = scalar_lea.sflag (!%p161_p1), [#allocation5], %s1450_s28 }
  0x28   : > { %s1195_s29 = smul.u32 (!%p161_p1), 1776, %s1450_s28 }
  0x2a   : > { %s1456_s4 = scalar_lea.vmem (!%p161_p1), [#allocation4], %s1195_s29 }
  0x2c   : > { %1321 = dma.done.wait (%p1413_p6), %s167_s30, 28416  }
  0x2d   : > { %1323 = vsyncadd (%p1413_p6), %s167_s30, 4294938880  ;;  %s196_s5 = sld [smem:[#allocation2]]  ;;  %v198_v0 = vld [vmem:[%s1456_s4] sm:$0xff]  ;;  %v199_v2 = vld [vmem:[%s1456_s4 + $0x8] sm:$0xff]  ;;  %s1491_s24 = scalar_lea.vmem [#allocation7], %s1195_s29 }
  0x2e   : > { %s197_s6 = sld [smem:[#allocation3]]  ;;  %v200_v3 = vld [vmem:[%s1456_s4 + $0x10] sm:$0xff]  ;;  %v201_v8 = vld [vmem:[%s1456_s4 + $0x18] sm:$0xff]  ;;  %v202_v9 = vld [vmem:[%s1456_s4 + $0x20] sm:$0xff]  ;;  %s1193_s7 = smul.u32 1776, %s1395_s0 }
  0x2f   : > { %v203_v10 = vld [vmem:[%s1456_s4 + $0x28] sm:$0xff]  ;;  %v204_v14 = vld [vmem:[%s1456_s4 + $0x30] sm:$0xff]  ;;  %v205_v15 = vld [vmem:[%s1456_s4 + $0x38] sm:$0xff]  ;;  %s1102_s10 = sshll.u32 %s1491_s24, 4  ;;  %s1089_s12 = scalar_lea.sflag [#allocation6], %s1450_s28  ;;  %s1103_s10 = int_to_ptr.vmem [resolvable:$true] %s1102_s10 }
  0x30   : > { %v206_v16 = vld [vmem:[%s1456_s4 + $0x40] sm:$0xff]  ;;  %v207_v21 = vld [vmem:[%s1456_s4 + $0x48] sm:$0xff]  ;;  %v208_v24 = vld [vmem:[%s1456_s4 + $0x50] sm:$0xff]  ;;  %s1101_s9 = scalar_lea.hbm %s2395_s3, %s1193_s7  ;;  %s1296_s21 = scalar_lea.hbm %s2395_s3, 3552 }
  0x31   : > { %v209_v27 = vld [vmem:[%s1456_s4 + $0x58] sm:$0xff]  ;;  %v210_v30 = vld [vmem:[%s1456_s4 + $0x60] sm:$0xff]  ;;  %v211_v33 = vld [vmem:[%s1456_s4 + $0x68] sm:$0xff]  ;;  %s1104_s11 = sshll.u32 %s1101_s9, 4  ;;  %s1105_s11 = int_to_ptr.hbm [resolvable:$true] %s1104_s11 }
  0x32   : > { %v212_v36 = vld [vmem:[%s1456_s4 + $0x70] sm:$0xff]  ;;  %v213_v39 = vld [vmem:[%s1456_s4 + $0x78] sm:$0xff]  ;;  %v214_v42 = vld [vmem:[%s1456_s4 + $0x80] sm:$0xff]  ;;  %s1290_s13 = sshra.s32 %s1105_s11, 4  ;;  %s1291_s13 = int_to_ptr.hbm [resolvable:$true] %s1290_s13 }
  0x33   : > { %v1463_v1 = vstv %s196_s5  ;;  %v215_v45 = vld [vmem:[%s1456_s4 + $0x88] sm:$0xff]  ;;  %v216_v48 = vld [vmem:[%s1456_s4 + $0x90] sm:$0xff]  ;;  %v217_v51 = vld [vmem:[%s1456_s4 + $0x98] sm:$0xff]  ;;  %s1292_s14 = scalar_lea.hbm %s1291_s13, 1776  ;;  %p1297_p3 = scmp.lt.s32.totalorder %s1291_s13, %s2395_s3 }
  0x34   : > { %v421_v4 = vmul.f32 %v1463_v1, %v198_v0  ;;  %v1468_v5 = vstv %s197_s6  ;;  %v422_v6 = vmul.f32 %v1463_v1, %v199_v2  ;;  %v423_v7 = vmul.f32 %v1463_v1, %v200_v3  ;;  %v218_v54 = vld [vmem:[%s1456_s4 + $0xa0] sm:$0xff]  ;;  %v219_v57 = vld [vmem:[%s1456_s4 + $0xa8] sm:$0xff]  ;;  %v220_v60 = vld [vmem:[%s1456_s4 + $0xb0] sm:$0xff]  ;;  %p1293_p6 = scmp.ne.s32.totalorder %s1291_s13, %s1292_s14  ;;  %p1298_p4 = scmp.lt.s32.totalorder %s1296_s21, %s1292_s14 }
  0x35   : > { %v424_v11 = vmul.f32 %v1463_v1, %v201_v8  ;;  %v425_v12 = vmul.f32 %v1463_v1, %v202_v9  ;;  %v426_v13 = vmul.f32 %v1463_v1, %v203_v10  ;;  %v427_v20 = vmul.f32 %v1463_v1, %v204_v14  ;;  %v221_v63 = vld [vmem:[%s1456_s4 + $0xb8] sm:$0xff]  ;;  %v222_v3 = vld [vmem:[%s1456_s4 + $0xc0] sm:$0xff]  ;;  %v224_v10 = vld [vmem:[%s1456_s4 + $0xd0] sm:$0xff] }
  0x36   : > { %v644_v17 = vadd.f32 %v1468_v5, %v421_v4  ;;  %v645_v18 = vadd.f32 %v1468_v5, %v422_v6  ;;  %v646_v19 = vadd.f32 %v1468_v5, %v423_v7  ;;  %v428_v23 = vmul.f32 %v1463_v1, %v205_v15  ;;  %v223_v7 = vld [vmem:[%s1456_s4 + $0xc8] sm:$0xff]  ;;  %p1294_p13 = pnand %p1293_p6, %p1420_p11  ;;  %p1299_p5 = por %p1298_p4, %p1297_p3 }
  0x37   : > { %v647_v22 = vadd.f32 %v1468_v5, %v424_v11  ;;  %v648_v25 = vadd.f32 %v1468_v5, %v425_v12  ;;  %v429_v26 = vmul.f32 %v1463_v1, %v206_v16  ;;  %v649_v28 = vadd.f32 %v1468_v5, %v426_v13  ;;  %v225_v13 = vld [vmem:[%s1456_s4 + $0xd8] sm:$0xff]  ;;  %v226_v16 = vld [vmem:[%s1456_s4 + $0xe0] sm:$0xff] }
  0x38   : > { %866 = vst [vmem:[%s1491_s24] sm:$0xff] %v644_v17  ;;  %v430_v29 = vmul.f32 %v1463_v1, %v207_v21  ;;  %v650_v31 = vadd.f32 %v1468_v5, %v427_v20  ;;  %v431_v32 = vmul.f32 %v1463_v1, %v208_v24  ;;  %v651_v34 = vadd.f32 %v1468_v5, %v428_v23  ;;  %p1295_p2 = pneg %p1294_p13 }
  0x39   : > { %867 = vst [vmem:[%s1491_s24 + $0x8] sm:$0xff] %v645_v18  ;;  %v432_v35 = vmul.f32 %v1463_v1, %v209_v27  ;;  %v652_v37 = vadd.f32 %v1468_v5, %v429_v26  ;;  %v433_v38 = vmul.f32 %v1463_v1, %v210_v30  ;;  %v434_v41 = vmul.f32 %v1463_v1, %v211_v33 }
  0x3a   : > { %868 = vst [vmem:[%s1491_s24 + $0x10] sm:$0xff] %v646_v19  ;;  %v653_v40 = vadd.f32 %v1468_v5, %v430_v29  ;;  %v654_v43 = vadd.f32 %v1468_v5, %v431_v32  ;;  %v435_v44 = vmul.f32 %v1463_v1, %v212_v36  ;;  %v436_v47 = vmul.f32 %v1463_v1, %v213_v39  ;;  %v227_v19 = vld [vmem:[%s1456_s4 + $0xe8] sm:$0xff]  ;;  %p1300_p7 = pnand %p1299_p5, %p1295_p2 }
  0x3b   : > { %869 = vst [vmem:[%s1491_s24 + $0x18] sm:$0xff] %v647_v22  ;;  %v655_v46 = vadd.f32 %v1468_v5, %v432_v35  ;;  %v656_v49 = vadd.f32 %v1468_v5, %v433_v38  ;;  %v437_v50 = vmul.f32 %v1463_v1, %v214_v42  ;;  %v657_v52 = vadd.f32 %v1468_v5, %v434_v41  ;;  %v228_v22 = vld [vmem:[%s1456_s4 + $0xf0] sm:$0xff] }
  0x3c   : > { %870 = vst [vmem:[%s1491_s24 + $0x20] sm:$0xff] %v648_v25  ;;  %v438_v53 = vmul.f32 %v1463_v1, %v215_v45  ;;  %v658_v55 = vadd.f32 %v1468_v5, %v435_v44  ;;  %v439_v56 = vmul.f32 %v1463_v1, %v216_v48  ;;  %v659_v58 = vadd.f32 %v1468_v5, %v436_v47  ;;  %v229_v25 = vld [vmem:[%s1456_s4 + $0xf8] sm:$0xff] }
  0x3d   : > { %871 = vst [vmem:[%s1491_s24 + $0x28] sm:$0xff] %v649_v28  ;;  %v440_v59 = vmul.f32 %v1463_v1, %v217_v51  ;;  %v660_v61 = vadd.f32 %v1468_v5, %v437_v50  ;;  %v441_v62 = vmul.f32 %v1463_v1, %v218_v54  ;;  %v442_v2 = vmul.f32 %v1463_v1, %v219_v57  ;;  %v230_v28 = vld [vmem:[%s1456_s4 + $0x100] sm:$0xff] }
  0x3e   : > { %872 = vst [vmem:[%s1491_s24 + $0x30] sm:$0xff] %v650_v31  ;;  %v661_v0 = vadd.f32 %v1468_v5, %v438_v53  ;;  %v662_v4 = vadd.f32 %v1468_v5, %v439_v56  ;;  %v443_v6 = vmul.f32 %v1463_v1, %v220_v60  ;;  %v444_v9 = vmul.f32 %v1463_v1, %v221_v63  ;;  %v231_v31 = vld [vmem:[%s1456_s4 + $0x108] sm:$0xff] }
  0x3f   : > { %873 = vst [vmem:[%s1491_s24 + $0x38] sm:$0xff] %v651_v34  ;;  %v663_v8 = vadd.f32 %v1468_v5, %v440_v59  ;;  %v664_v11 = vadd.f32 %v1468_v5, %v441_v62  ;;  %v445_v12 = vmul.f32 %v1463_v1, %v222_v3  ;;  %v665_v14 = vadd.f32 %v1468_v5, %v442_v2  ;;  %v232_v34 = vld [vmem:[%s1456_s4 + $0x110] sm:$0xff] }
  0x40   : > { %874 = vst [vmem:[%s1491_s24 + $0x40] sm:$0xff] %v652_v37  ;;  %v446_v15 = vmul.f32 %v1463_v1, %v223_v7  ;;  %v666_v17 = vadd.f32 %v1468_v5, %v443_v6  ;;  %v447_v18 = vmul.f32 %v1463_v1, %v224_v10  ;;  %v667_v20 = vadd.f32 %v1468_v5, %v444_v9  ;;  %v233_v37 = vld [vmem:[%s1456_s4 + $0x118] sm:$0xff] }
  0x41   : > { %875 = vst [vmem:[%s1491_s24 + $0x48] sm:$0xff] %v653_v40  ;;  %v448_v21 = vmul.f32 %v1463_v1, %v225_v13  ;;  %v668_v23 = vadd.f32 %v1468_v5, %v445_v12  ;;  %v449_v24 = vmul.f32 %v1463_v1, %v226_v16  ;;  %v450_v27 = vmul.f32 %v1463_v1, %v227_v19  ;;  %v234_v40 = vld [vmem:[%s1456_s4 + $0x120] sm:$0xff] }
  0x42   : > { %876 = vst [vmem:[%s1491_s24 + $0x50] sm:$0xff] %v654_v43  ;;  %v669_v26 = vadd.f32 %v1468_v5, %v446_v15  ;;  %v670_v29 = vadd.f32 %v1468_v5, %v447_v18  ;;  %v451_v30 = vmul.f32 %v1463_v1, %v228_v22  ;;  %v452_v33 = vmul.f32 %v1463_v1, %v229_v25  ;;  %v235_v43 = vld [vmem:[%s1456_s4 + $0x128] sm:$0xff] }
  0x43   : > { %877 = vst [vmem:[%s1491_s24 + $0x58] sm:$0xff] %v655_v46  ;;  %v671_v32 = vadd.f32 %v1468_v5, %v448_v21  ;;  %v672_v35 = vadd.f32 %v1468_v5, %v449_v24  ;;  %v453_v36 = vmul.f32 %v1463_v1, %v230_v28  ;;  %v673_v38 = vadd.f32 %v1468_v5, %v450_v27  ;;  %v236_v46 = vld [vmem:[%s1456_s4 + $0x130] sm:$0xff] }
  0x44   : > { %878 = vst [vmem:[%s1491_s24 + $0x60] sm:$0xff] %v656_v49  ;;  %v454_v39 = vmul.f32 %v1463_v1, %v231_v31  ;;  %v674_v41 = vadd.f32 %v1468_v5, %v451_v30  ;;  %v455_v42 = vmul.f32 %v1463_v1, %v232_v34  ;;  %v675_v44 = vadd.f32 %v1468_v5, %v452_v33  ;;  %v237_v49 = vld [vmem:[%s1456_s4 + $0x138] sm:$0xff] }
  0x45   : > { %879 = vst [vmem:[%s1491_s24 + $0x68] sm:$0xff] %v657_v52  ;;  %v456_v45 = vmul.f32 %v1463_v1, %v233_v37  ;;  %v676_v47 = vadd.f32 %v1468_v5, %v453_v36  ;;  %v457_v48 = vmul.f32 %v1463_v1, %v234_v40  ;;  %v458_v51 = vmul.f32 %v1463_v1, %v235_v43  ;;  %v238_v52 = vld [vmem:[%s1456_s4 + $0x140] sm:$0xff] }
  0x46   : > { %880 = vst [vmem:[%s1491_s24 + $0x70] sm:$0xff] %v658_v55  ;;  %v677_v50 = vadd.f32 %v1468_v5, %v454_v39  ;;  %v678_v53 = vadd.f32 %v1468_v5, %v455_v42  ;;  %v459_v54 = vmul.f32 %v1463_v1, %v236_v46  ;;  %v239_v55 = vld [vmem:[%s1456_s4 + $0x148] sm:$0xff]  ;;  %v460_v57 = vmul.f32 %v1463_v1, %v237_v49 }
  0x47   : > { %881 = vst [vmem:[%s1491_s24 + $0x78] sm:$0xff] %v659_v58  ;;  %v679_v56 = vadd.f32 %v1468_v5, %v456_v45  ;;  %v240_v58 = vld [vmem:[%s1456_s4 + $0x150] sm:$0xff]  ;;  %v680_v59 = vadd.f32 %v1468_v5, %v457_v48  ;;  %v461_v60 = vmul.f32 %v1463_v1, %v238_v52  ;;  %v681_v62 = vadd.f32 %v1468_v5, %v458_v51 }
  0x48   : > { %882 = vst [vmem:[%s1491_s24 + $0x80] sm:$0xff] %v660_v61  ;;  %v241_v61 = vld [vmem:[%s1456_s4 + $0x158] sm:$0xff]  ;;  %v462_v63 = vmul.f32 %v1463_v1, %v239_v55  ;;  %v682_v2 = vadd.f32 %v1468_v5, %v459_v54  ;;  %v463_v3 = vmul.f32 %v1463_v1, %v240_v58  ;;  %v683_v6 = vadd.f32 %v1468_v5, %v460_v57 }
  0x49   : > { %883 = vst [vmem:[%s1491_s24 + $0x88] sm:$0xff] %v661_v0  ;;  %v242_v0 = vld [vmem:[%s1456_s4 + $0x160] sm:$0xff]  ;;  %v464_v7 = vmul.f32 %v1463_v1, %v241_v61  ;;  %v684_v9 = vadd.f32 %v1468_v5, %v461_v60 }
  0x4a   : > { %884 = vst [vmem:[%s1491_s24 + $0x90] sm:$0xff] %v662_v4  ;;  %v243_v4 = vld [vmem:[%s1456_s4 + $0x168] sm:$0xff]  ;;  %v465_v10 = vmul.f32 %v1463_v1, %v242_v0  ;;  %v685_v12 = vadd.f32 %v1468_v5, %v462_v63  ;;  %v686_v15 = vadd.f32 %v1468_v5, %v463_v3 }
  0x4b   : > { %885 = vst [vmem:[%s1491_s24 + $0x98] sm:$0xff] %v663_v8  ;;  %v244_v8 = vld [vmem:[%s1456_s4 + $0x170] sm:$0xff]  ;;  %v466_v13 = vmul.f32 %v1463_v1, %v243_v4  ;;  %v687_v18 = vadd.f32 %v1468_v5, %v464_v7 }
  0x4c   : > { %886 = vst [vmem:[%s1491_s24 + $0xa0] sm:$0xff] %v664_v11  ;;  %v245_v11 = vld [vmem:[%s1456_s4 + $0x178] sm:$0xff]  ;;  %v467_v16 = vmul.f32 %v1463_v1, %v244_v8  ;;  %v688_v21 = vadd.f32 %v1468_v5, %v465_v10 }
  0x4d   : > { %887 = vst [vmem:[%s1491_s24 + $0xa8] sm:$0xff] %v665_v14  ;;  %v246_v14 = vld [vmem:[%s1456_s4 + $0x180] sm:$0xff]  ;;  %v468_v19 = vmul.f32 %v1463_v1, %v245_v11  ;;  %v689_v24 = vadd.f32 %v1468_v5, %v466_v13 }
  0x4e   : > { %888 = vst [vmem:[%s1491_s24 + $0xb0] sm:$0xff] %v666_v17  ;;  %v247_v17 = vld [vmem:[%s1456_s4 + $0x188] sm:$0xff]  ;;  %v469_v22 = vmul.f32 %v1463_v1, %v246_v14  ;;  %v690_v27 = vadd.f32 %v1468_v5, %v467_v16 }
  0x4f   : > { %889 = vst [vmem:[%s1491_s24 + $0xb8] sm:$0xff] %v667_v20  ;;  %v248_v20 = vld [vmem:[%s1456_s4 + $0x190] sm:$0xff]  ;;  %v470_v25 = vmul.f32 %v1463_v1, %v247_v17  ;;  %v691_v30 = vadd.f32 %v1468_v5, %v468_v19 }
  0x50   : > { %890 = vst [vmem:[%s1491_s24 + $0xc0] sm:$0xff] %v668_v23  ;;  %v249_v23 = vld [vmem:[%s1456_s4 + $0x198] sm:$0xff]  ;;  %v471_v28 = vmul.f32 %v1463_v1, %v248_v20  ;;  %v692_v33 = vadd.f32 %v1468_v5, %v469_v22 }
  0x51   : > { %891 = vst [vmem:[%s1491_s24 + $0xc8] sm:$0xff] %v669_v26  ;;  %v250_v26 = vld [vmem:[%s1456_s4 + $0x1a0] sm:$0xff]  ;;  %v472_v31 = vmul.f32 %v1463_v1, %v249_v23  ;;  %v693_v36 = vadd.f32 %v1468_v5, %v470_v25 }
  0x52   : > { %892 = vst [vmem:[%s1491_s24 + $0xd0] sm:$0xff] %v670_v29  ;;  %v251_v29 = vld [vmem:[%s1456_s4 + $0x1a8] sm:$0xff]  ;;  %v473_v34 = vmul.f32 %v1463_v1, %v250_v26  ;;  %v694_v39 = vadd.f32 %v1468_v5, %v471_v28 }
  0x53   : > { %893 = vst [vmem:[%s1491_s24 + $0xd8] sm:$0xff] %v671_v32  ;;  %v252_v32 = vld [vmem:[%s1456_s4 + $0x1b0] sm:$0xff]  ;;  %v474_v37 = vmul.f32 %v1463_v1, %v251_v29  ;;  %v695_v42 = vadd.f32 %v1468_v5, %v472_v31 }
  0x54   : > { %894 = vst [vmem:[%s1491_s24 + $0xe0] sm:$0xff] %v672_v35  ;;  %v253_v35 = vld [vmem:[%s1456_s4 + $0x1b8] sm:$0xff]  ;;  %v475_v40 = vmul.f32 %v1463_v1, %v252_v32  ;;  %v696_v45 = vadd.f32 %v1468_v5, %v473_v34 }
  0x55   : > { %895 = vst [vmem:[%s1491_s24 + $0xe8] sm:$0xff] %v673_v38  ;;  %v254_v38 = vld [vmem:[%s1456_s4 + $0x1c0] sm:$0xff]  ;;  %v476_v43 = vmul.f32 %v1463_v1, %v253_v35  ;;  %v697_v48 = vadd.f32 %v1468_v5, %v474_v37 }
  0x56   : > { %896 = vst [vmem:[%s1491_s24 + $0xf0] sm:$0xff] %v674_v41  ;;  %v255_v41 = vld [vmem:[%s1456_s4 + $0x1c8] sm:$0xff]  ;;  %v477_v46 = vmul.f32 %v1463_v1, %v254_v38  ;;  %v698_v51 = vadd.f32 %v1468_v5, %v475_v40 }
  0x57   : > { %897 = vst [vmem:[%s1491_s24 + $0xf8] sm:$0xff] %v675_v44  ;;  %v256_v44 = vld [vmem:[%s1456_s4 + $0x1d0] sm:$0xff]  ;;  %v478_v49 = vmul.f32 %v1463_v1, %v255_v41  ;;  %v699_v54 = vadd.f32 %v1468_v5, %v476_v43 }
  0x58   : > { %898 = vst [vmem:[%s1491_s24 + $0x100] sm:$0xff] %v676_v47  ;;  %v257_v47 = vld [vmem:[%s1456_s4 + $0x1d8] sm:$0xff]  ;;  %v479_v52 = vmul.f32 %v1463_v1, %v256_v44  ;;  %v700_v57 = vadd.f32 %v1468_v5, %v477_v46 }
  0x59   : > { %899 = vst [vmem:[%s1491_s24 + $0x108] sm:$0xff] %v677_v50  ;;  %v258_v50 = vld [vmem:[%s1456_s4 + $0x1e0] sm:$0xff]  ;;  %v480_v55 = vmul.f32 %v1463_v1, %v257_v47  ;;  %v701_v60 = vadd.f32 %v1468_v5, %v478_v49 }
  0x5a   : > { %900 = vst [vmem:[%s1491_s24 + $0x110] sm:$0xff] %v678_v53  ;;  %v259_v53 = vld [vmem:[%s1456_s4 + $0x1e8] sm:$0xff]  ;;  %v481_v58 = vmul.f32 %v1463_v1, %v258_v50  ;;  %v702_v63 = vadd.f32 %v1468_v5, %v479_v52 }
  0x5b   : > { %901 = vst [vmem:[%s1491_s24 + $0x118] sm:$0xff] %v679_v56  ;;  %v260_v56 = vld [vmem:[%s1456_s4 + $0x1f0] sm:$0xff]  ;;  %v482_v61 = vmul.f32 %v1463_v1, %v259_v53  ;;  %v703_v3 = vadd.f32 %v1468_v5, %v480_v55 }
  0x5c   : > { %902 = vst [vmem:[%s1491_s24 + $0x120] sm:$0xff] %v680_v59  ;;  %v261_v59 = vld [vmem:[%s1456_s4 + $0x1f8] sm:$0xff]  ;;  %v483_v0 = vmul.f32 %v1463_v1, %v260_v56  ;;  %v704_v7 = vadd.f32 %v1468_v5, %v481_v58 }
  0x5d   : > { %903 = vst [vmem:[%s1491_s24 + $0x128] sm:$0xff] %v681_v62  ;;  %v262_v62 = vld [vmem:[%s1456_s4 + $0x200] sm:$0xff]  ;;  %v484_v4 = vmul.f32 %v1463_v1, %v261_v59  ;;  %v705_v10 = vadd.f32 %v1468_v5, %v482_v61 }
  0x5e   : > { %904 = vst [vmem:[%s1491_s24 + $0x130] sm:$0xff] %v682_v2  ;;  %v263_v2 = vld [vmem:[%s1456_s4 + $0x208] sm:$0xff]  ;;  %v485_v8 = vmul.f32 %v1463_v1, %v262_v62  ;;  %v706_v13 = vadd.f32 %v1468_v5, %v483_v0 }
  0x5f   : > { %905 = vst [vmem:[%s1491_s24 + $0x138] sm:$0xff] %v683_v6  ;;  %v264_v6 = vld [vmem:[%s1456_s4 + $0x210] sm:$0xff]  ;;  %v486_v11 = vmul.f32 %v1463_v1, %v263_v2  ;;  %v707_v16 = vadd.f32 %v1468_v5, %v484_v4 }
  0x60   : > { %906 = vst [vmem:[%s1491_s24 + $0x140] sm:$0xff] %v684_v9  ;;  %v265_v9 = vld [vmem:[%s1456_s4 + $0x218] sm:$0xff]  ;;  %v487_v14 = vmul.f32 %v1463_v1, %v264_v6  ;;  %v708_v19 = vadd.f32 %v1468_v5, %v485_v8 }
  0x61   : > { %907 = vst [vmem:[%s1491_s24 + $0x148] sm:$0xff] %v685_v12  ;;  %v266_v12 = vld [vmem:[%s1456_s4 + $0x220] sm:$0xff]  ;;  %v488_v17 = vmul.f32 %v1463_v1, %v265_v9  ;;  %v709_v22 = vadd.f32 %v1468_v5, %v486_v11 }
  0x62   : > { %908 = vst [vmem:[%s1491_s24 + $0x150] sm:$0xff] %v686_v15  ;;  %v267_v15 = vld [vmem:[%s1456_s4 + $0x228] sm:$0xff]  ;;  %v489_v20 = vmul.f32 %v1463_v1, %v266_v12  ;;  %v710_v25 = vadd.f32 %v1468_v5, %v487_v14 }
  0x63   : > { %909 = vst [vmem:[%s1491_s24 + $0x158] sm:$0xff] %v687_v18  ;;  %v268_v18 = vld [vmem:[%s1456_s4 + $0x230] sm:$0xff]  ;;  %v490_v23 = vmul.f32 %v1463_v1, %v267_v15  ;;  %v711_v28 = vadd.f32 %v1468_v5, %v488_v17 }
  0x64   : > { %910 = vst [vmem:[%s1491_s24 + $0x160] sm:$0xff] %v688_v21  ;;  %v269_v21 = vld [vmem:[%s1456_s4 + $0x238] sm:$0xff]  ;;  %v491_v26 = vmul.f32 %v1463_v1, %v268_v18  ;;  %v712_v31 = vadd.f32 %v1468_v5, %v489_v20 }
  0x65   : > { %911 = vst [vmem:[%s1491_s24 + $0x168] sm:$0xff] %v689_v24  ;;  %v270_v24 = vld [vmem:[%s1456_s4 + $0x240] sm:$0xff]  ;;  %v492_v29 = vmul.f32 %v1463_v1, %v269_v21  ;;  %v713_v34 = vadd.f32 %v1468_v5, %v490_v23 }
  0x66   : > { %912 = vst [vmem:[%s1491_s24 + $0x170] sm:$0xff] %v690_v27  ;;  %v271_v27 = vld [vmem:[%s1456_s4 + $0x248] sm:$0xff]  ;;  %v493_v32 = vmul.f32 %v1463_v1, %v270_v24  ;;  %v714_v37 = vadd.f32 %v1468_v5, %v491_v26 }
  0x67   : > { %913 = vst [vmem:[%s1491_s24 + $0x178] sm:$0xff] %v691_v30  ;;  %v272_v30 = vld [vmem:[%s1456_s4 + $0x250] sm:$0xff]  ;;  %v494_v35 = vmul.f32 %v1463_v1, %v271_v27  ;;  %v715_v40 = vadd.f32 %v1468_v5, %v492_v29 }
  0x68   : > { %914 = vst [vmem:[%s1491_s24 + $0x180] sm:$0xff] %v692_v33  ;;  %v273_v33 = vld [vmem:[%s1456_s4 + $0x258] sm:$0xff]  ;;  %v495_v38 = vmul.f32 %v1463_v1, %v272_v30  ;;  %v716_v43 = vadd.f32 %v1468_v5, %v493_v32 }
  0x69   : > { %915 = vst [vmem:[%s1491_s24 + $0x188] sm:$0xff] %v693_v36  ;;  %v274_v36 = vld [vmem:[%s1456_s4 + $0x260] sm:$0xff]  ;;  %v496_v41 = vmul.f32 %v1463_v1, %v273_v33  ;;  %v717_v46 = vadd.f32 %v1468_v5, %v494_v35 }
  0x6a   : > { %916 = vst [vmem:[%s1491_s24 + $0x190] sm:$0xff] %v694_v39  ;;  %v275_v39 = vld [vmem:[%s1456_s4 + $0x268] sm:$0xff]  ;;  %v497_v44 = vmul.f32 %v1463_v1, %v274_v36  ;;  %v718_v49 = vadd.f32 %v1468_v5, %v495_v38 }
  0x6b   : > { %917 = vst [vmem:[%s1491_s24 + $0x198] sm:$0xff] %v695_v42  ;;  %v276_v42 = vld [vmem:[%s1456_s4 + $0x270] sm:$0xff]  ;;  %v498_v47 = vmul.f32 %v1463_v1, %v275_v39  ;;  %v719_v52 = vadd.f32 %v1468_v5, %v496_v41 }
  0x6c   : > { %918 = vst [vmem:[%s1491_s24 + $0x1a0] sm:$0xff] %v696_v45  ;;  %v277_v45 = vld [vmem:[%s1456_s4 + $0x278] sm:$0xff]  ;;  %v499_v50 = vmul.f32 %v1463_v1, %v276_v42  ;;  %v720_v55 = vadd.f32 %v1468_v5, %v497_v44 }
  0x6d   : > { %919 = vst [vmem:[%s1491_s24 + $0x1a8] sm:$0xff] %v697_v48  ;;  %v278_v48 = vld [vmem:[%s1456_s4 + $0x280] sm:$0xff]  ;;  %v500_v53 = vmul.f32 %v1463_v1, %v277_v45  ;;  %v721_v58 = vadd.f32 %v1468_v5, %v498_v47 }
  0x6e   : > { %920 = vst [vmem:[%s1491_s24 + $0x1b0] sm:$0xff] %v698_v51  ;;  %v279_v51 = vld [vmem:[%s1456_s4 + $0x288] sm:$0xff]  ;;  %v501_v56 = vmul.f32 %v1463_v1, %v278_v48  ;;  %v722_v61 = vadd.f32 %v1468_v5, %v499_v50 }
  0x6f   : > { %921 = vst [vmem:[%s1491_s24 + $0x1b8] sm:$0xff] %v699_v54  ;;  %v280_v54 = vld [vmem:[%s1456_s4 + $0x290] sm:$0xff]  ;;  %v502_v59 = vmul.f32 %v1463_v1, %v279_v51  ;;  %v723_v0 = vadd.f32 %v1468_v5, %v500_v53 }
  0x70   : > { %922 = vst [vmem:[%s1491_s24 + $0x1c0] sm:$0xff] %v700_v57  ;;  %v281_v57 = vld [vmem:[%s1456_s4 + $0x298] sm:$0xff]  ;;  %v503_v62 = vmul.f32 %v1463_v1, %v280_v54  ;;  %v724_v4 = vadd.f32 %v1468_v5, %v501_v56 }
  0x71   : > { %923 = vst [vmem:[%s1491_s24 + $0x1c8] sm:$0xff] %v701_v60  ;;  %v282_v60 = vld [vmem:[%s1456_s4 + $0x2a0] sm:$0xff]  ;;  %v504_v2 = vmul.f32 %v1463_v1, %v281_v57  ;;  %v725_v8 = vadd.f32 %v1468_v5, %v502_v59 }
  0x72   : > { %924 = vst [vmem:[%s1491_s24 + $0x1d0] sm:$0xff] %v702_v63  ;;  %v283_v63 = vld [vmem:[%s1456_s4 + $0x2a8] sm:$0xff]  ;;  %v505_v6 = vmul.f32 %v1463_v1, %v282_v60  ;;  %v726_v11 = vadd.f32 %v1468_v5, %v503_v62 }
  0x73   : > { %925 = vst [vmem:[%s1491_s24 + $0x1d8] sm:$0xff] %v703_v3  ;;  %v284_v3 = vld [vmem:[%s1456_s4 + $0x2b0] sm:$0xff]  ;;  %v506_v9 = vmul.f32 %v1463_v1, %v283_v63  ;;  %v727_v14 = vadd.f32 %v1468_v5, %v504_v2 }
  0x74   : > { %926 = vst [vmem:[%s1491_s24 + $0x1e0] sm:$0xff] %v704_v7  ;;  %v285_v7 = vld [vmem:[%s1456_s4 + $0x2b8] sm:$0xff]  ;;  %v507_v12 = vmul.f32 %v1463_v1, %v284_v3  ;;  %v728_v17 = vadd.f32 %v1468_v5, %v505_v6 }
  0x75   : > { %927 = vst [vmem:[%s1491_s24 + $0x1e8] sm:$0xff] %v705_v10  ;;  %v286_v10 = vld [vmem:[%s1456_s4 + $0x2c0] sm:$0xff]  ;;  %v508_v15 = vmul.f32 %v1463_v1, %v285_v7  ;;  %v729_v20 = vadd.f32 %v1468_v5, %v506_v9 }
  0x76   : > { %928 = vst [vmem:[%s1491_s24 + $0x1f0] sm:$0xff] %v706_v13  ;;  %v287_v13 = vld [vmem:[%s1456_s4 + $0x2c8] sm:$0xff]  ;;  %v509_v18 = vmul.f32 %v1463_v1, %v286_v10  ;;  %v730_v23 = vadd.f32 %v1468_v5, %v507_v12 }
  0x77   : > { %929 = vst [vmem:[%s1491_s24 + $0x1f8] sm:$0xff] %v707_v16  ;;  %v288_v16 = vld [vmem:[%s1456_s4 + $0x2d0] sm:$0xff]  ;;  %v510_v21 = vmul.f32 %v1463_v1, %v287_v13  ;;  %v731_v26 = vadd.f32 %v1468_v5, %v508_v15 }
  0x78   : > { %930 = vst [vmem:[%s1491_s24 + $0x200] sm:$0xff] %v708_v19  ;;  %v289_v19 = vld [vmem:[%s1456_s4 + $0x2d8] sm:$0xff]  ;;  %v511_v24 = vmul.f32 %v1463_v1, %v288_v16  ;;  %v732_v29 = vadd.f32 %v1468_v5, %v509_v18 }
  0x79   : > { %931 = vst [vmem:[%s1491_s24 + $0x208] sm:$0xff] %v709_v22  ;;  %v290_v22 = vld [vmem:[%s1456_s4 + $0x2e0] sm:$0xff]  ;;  %v512_v27 = vmul.f32 %v1463_v1, %v289_v19  ;;  %v733_v32 = vadd.f32 %v1468_v5, %v510_v21 }
  0x7a   : > { %932 = vst [vmem:[%s1491_s24 + $0x210] sm:$0xff] %v710_v25  ;;  %v291_v25 = vld [vmem:[%s1456_s4 + $0x2e8] sm:$0xff]  ;;  %v513_v30 = vmul.f32 %v1463_v1, %v290_v22  ;;  %v734_v35 = vadd.f32 %v1468_v5, %v511_v24 }
  0x7b   : > { %933 = vst [vmem:[%s1491_s24 + $0x218] sm:$0xff] %v711_v28  ;;  %v292_v28 = vld [vmem:[%s1456_s4 + $0x2f0] sm:$0xff]  ;;  %v514_v33 = vmul.f32 %v1463_v1, %v291_v25  ;;  %v735_v38 = vadd.f32 %v1468_v5, %v512_v27 }
  0x7c   : > { %934 = vst [vmem:[%s1491_s24 + $0x220] sm:$0xff] %v712_v31  ;;  %v293_v31 = vld [vmem:[%s1456_s4 + $0x2f8] sm:$0xff]  ;;  %v515_v36 = vmul.f32 %v1463_v1, %v292_v28  ;;  %v736_v41 = vadd.f32 %v1468_v5, %v513_v30 }
  0x7d   : > { %935 = vst [vmem:[%s1491_s24 + $0x228] sm:$0xff] %v713_v34  ;;  %v294_v34 = vld [vmem:[%s1456_s4 + $0x300] sm:$0xff]  ;;  %v516_v39 = vmul.f32 %v1463_v1, %v293_v31  ;;  %v737_v44 = vadd.f32 %v1468_v5, %v514_v33 }
  0x7e   : > { %936 = vst [vmem:[%s1491_s24 + $0x230] sm:$0xff] %v714_v37  ;;  %v295_v37 = vld [vmem:[%s1456_s4 + $0x308] sm:$0xff]  ;;  %v517_v42 = vmul.f32 %v1463_v1, %v294_v34  ;;  %v738_v47 = vadd.f32 %v1468_v5, %v515_v36 }
  0x7f   : > { %937 = vst [vmem:[%s1491_s24 + $0x238] sm:$0xff] %v715_v40  ;;  %v296_v40 = vld [vmem:[%s1456_s4 + $0x310] sm:$0xff]  ;;  %v518_v45 = vmul.f32 %v1463_v1, %v295_v37  ;;  %v739_v50 = vadd.f32 %v1468_v5, %v516_v39 }
  0x80   : > { %938 = vst [vmem:[%s1491_s24 + $0x240] sm:$0xff] %v716_v43  ;;  %v297_v43 = vld [vmem:[%s1456_s4 + $0x318] sm:$0xff]  ;;  %v519_v48 = vmul.f32 %v1463_v1, %v296_v40  ;;  %v740_v53 = vadd.f32 %v1468_v5, %v517_v42 }
  0x81   : > { %939 = vst [vmem:[%s1491_s24 + $0x248] sm:$0xff] %v717_v46  ;;  %v298_v46 = vld [vmem:[%s1456_s4 + $0x320] sm:$0xff]  ;;  %v520_v51 = vmul.f32 %v1463_v1, %v297_v43  ;;  %v741_v56 = vadd.f32 %v1468_v5, %v518_v45 }
  0x82   : > { %940 = vst [vmem:[%s1491_s24 + $0x250] sm:$0xff] %v718_v49  ;;  %v299_v49 = vld [vmem:[%s1456_s4 + $0x328] sm:$0xff]  ;;  %v521_v54 = vmul.f32 %v1463_v1, %v298_v46  ;;  %v742_v59 = vadd.f32 %v1468_v5, %v519_v48 }
  0x83   : > { %941 = vst [vmem:[%s1491_s24 + $0x258] sm:$0xff] %v719_v52  ;;  %v300_v52 = vld [vmem:[%s1456_s4 + $0x330] sm:$0xff]  ;;  %v522_v57 = vmul.f32 %v1463_v1, %v299_v49  ;;  %v743_v62 = vadd.f32 %v1468_v5, %v520_v51 }
  0x84   : > { %942 = vst [vmem:[%s1491_s24 + $0x260] sm:$0xff] %v720_v55  ;;  %v301_v55 = vld [vmem:[%s1456_s4 + $0x338] sm:$0xff]  ;;  %v523_v60 = vmul.f32 %v1463_v1, %v300_v52  ;;  %v744_v2 = vadd.f32 %v1468_v5, %v521_v54 }
  0x85   : > { %943 = vst [vmem:[%s1491_s24 + $0x268] sm:$0xff] %v721_v58  ;;  %v302_v58 = vld [vmem:[%s1456_s4 + $0x340] sm:$0xff]  ;;  %v524_v63 = vmul.f32 %v1463_v1, %v301_v55  ;;  %v745_v6 = vadd.f32 %v1468_v5, %v522_v57 }
  0x86   : > { %944 = vst [vmem:[%s1491_s24 + $0x270] sm:$0xff] %v722_v61  ;;  %v303_v61 = vld [vmem:[%s1456_s4 + $0x348] sm:$0xff]  ;;  %v525_v3 = vmul.f32 %v1463_v1, %v302_v58  ;;  %v746_v9 = vadd.f32 %v1468_v5, %v523_v60 }
  0x87   : > { %945 = vst [vmem:[%s1491_s24 + $0x278] sm:$0xff] %v723_v0  ;;  %v304_v0 = vld [vmem:[%s1456_s4 + $0x350] sm:$0xff]  ;;  %v526_v7 = vmul.f32 %v1463_v1, %v303_v61  ;;  %v747_v12 = vadd.f32 %v1468_v5, %v524_v63 }
  0x88   : > { %946 = vst [vmem:[%s1491_s24 + $0x280] sm:$0xff] %v724_v4  ;;  %v305_v4 = vld [vmem:[%s1456_s4 + $0x358] sm:$0xff]  ;;  %v527_v10 = vmul.f32 %v1463_v1, %v304_v0  ;;  %v748_v15 = vadd.f32 %v1468_v5, %v525_v3 }
  0x89   : > { %947 = vst [vmem:[%s1491_s24 + $0x288] sm:$0xff] %v725_v8  ;;  %v306_v8 = vld [vmem:[%s1456_s4 + $0x360] sm:$0xff]  ;;  %v528_v13 = vmul.f32 %v1463_v1, %v305_v4  ;;  %v749_v18 = vadd.f32 %v1468_v5, %v526_v7 }
  0x8a   : > { %948 = vst [vmem:[%s1491_s24 + $0x290] sm:$0xff] %v726_v11  ;;  %v307_v11 = vld [vmem:[%s1456_s4 + $0x368] sm:$0xff]  ;;  %v529_v16 = vmul.f32 %v1463_v1, %v306_v8  ;;  %v750_v21 = vadd.f32 %v1468_v5, %v527_v10 }
  0x8b   : > { %949 = vst [vmem:[%s1491_s24 + $0x298] sm:$0xff] %v727_v14  ;;  %v308_v14 = vld [vmem:[%s1456_s4 + $0x370] sm:$0xff]  ;;  %v530_v19 = vmul.f32 %v1463_v1, %v307_v11  ;;  %v751_v24 = vadd.f32 %v1468_v5, %v528_v13 }
  0x8c   : > { %950 = vst [vmem:[%s1491_s24 + $0x2a0] sm:$0xff] %v728_v17  ;;  %v309_v17 = vld [vmem:[%s1456_s4 + $0x378] sm:$0xff]  ;;  %v531_v22 = vmul.f32 %v1463_v1, %v308_v14  ;;  %v752_v27 = vadd.f32 %v1468_v5, %v529_v16 }
  0x8d   : > { %951 = vst [vmem:[%s1491_s24 + $0x2a8] sm:$0xff] %v729_v20  ;;  %v310_v20 = vld [vmem:[%s1456_s4 + $0x380] sm:$0xff]  ;;  %v532_v25 = vmul.f32 %v1463_v1, %v309_v17  ;;  %v753_v30 = vadd.f32 %v1468_v5, %v530_v19 }
  0x8e   : > { %952 = vst [vmem:[%s1491_s24 + $0x2b0] sm:$0xff] %v730_v23  ;;  %v311_v23 = vld [vmem:[%s1456_s4 + $0x388] sm:$0xff]  ;;  %v533_v28 = vmul.f32 %v1463_v1, %v310_v20  ;;  %v754_v33 = vadd.f32 %v1468_v5, %v531_v22 }
  0x8f   : > { %953 = vst [vmem:[%s1491_s24 + $0x2b8] sm:$0xff] %v731_v26  ;;  %v312_v26 = vld [vmem:[%s1456_s4 + $0x390] sm:$0xff]  ;;  %v534_v31 = vmul.f32 %v1463_v1, %v311_v23  ;;  %v755_v36 = vadd.f32 %v1468_v5, %v532_v25 }
  0x90   : > { %954 = vst [vmem:[%s1491_s24 + $0x2c0] sm:$0xff] %v732_v29  ;;  %v313_v29 = vld [vmem:[%s1456_s4 + $0x398] sm:$0xff]  ;;  %v535_v34 = vmul.f32 %v1463_v1, %v312_v26  ;;  %v756_v39 = vadd.f32 %v1468_v5, %v533_v28 }
  0x91   : > { %955 = vst [vmem:[%s1491_s24 + $0x2c8] sm:$0xff] %v733_v32  ;;  %v314_v32 = vld [vmem:[%s1456_s4 + $0x3a0] sm:$0xff]  ;;  %v536_v37 = vmul.f32 %v1463_v1, %v313_v29  ;;  %v757_v42 = vadd.f32 %v1468_v5, %v534_v31 }
  0x92   : > { %956 = vst [vmem:[%s1491_s24 + $0x2d0] sm:$0xff] %v734_v35  ;;  %v315_v35 = vld [vmem:[%s1456_s4 + $0x3a8] sm:$0xff]  ;;  %v537_v40 = vmul.f32 %v1463_v1, %v314_v32  ;;  %v758_v45 = vadd.f32 %v1468_v5, %v535_v34 }
  0x93   : > { %957 = vst [vmem:[%s1491_s24 + $0x2d8] sm:$0xff] %v735_v38  ;;  %v316_v38 = vld [vmem:[%s1456_s4 + $0x3b0] sm:$0xff]  ;;  %v538_v43 = vmul.f32 %v1463_v1, %v315_v35  ;;  %v759_v48 = vadd.f32 %v1468_v5, %v536_v37 }
  0x94   : > { %958 = vst [vmem:[%s1491_s24 + $0x2e0] sm:$0xff] %v736_v41  ;;  %v317_v41 = vld [vmem:[%s1456_s4 + $0x3b8] sm:$0xff]  ;;  %v539_v46 = vmul.f32 %v1463_v1, %v316_v38  ;;  %v760_v51 = vadd.f32 %v1468_v5, %v537_v40 }
  0x95   : > { %959 = vst [vmem:[%s1491_s24 + $0x2e8] sm:$0xff] %v737_v44  ;;  %v318_v44 = vld [vmem:[%s1456_s4 + $0x3c0] sm:$0xff]  ;;  %v540_v49 = vmul.f32 %v1463_v1, %v317_v41  ;;  %v761_v54 = vadd.f32 %v1468_v5, %v538_v43 }
  0x96   : > { %960 = vst [vmem:[%s1491_s24 + $0x2f0] sm:$0xff] %v738_v47  ;;  %v319_v47 = vld [vmem:[%s1456_s4 + $0x3c8] sm:$0xff]  ;;  %v541_v52 = vmul.f32 %v1463_v1, %v318_v44  ;;  %v762_v57 = vadd.f32 %v1468_v5, %v539_v46 }
  0x97   : > { %961 = vst [vmem:[%s1491_s24 + $0x2f8] sm:$0xff] %v739_v50  ;;  %v320_v50 = vld [vmem:[%s1456_s4 + $0x3d0] sm:$0xff]  ;;  %v542_v55 = vmul.f32 %v1463_v1, %v319_v47  ;;  %v763_v60 = vadd.f32 %v1468_v5, %v540_v49 }
  0x98   : > { %962 = vst [vmem:[%s1491_s24 + $0x300] sm:$0xff] %v740_v53  ;;  %v321_v53 = vld [vmem:[%s1456_s4 + $0x3d8] sm:$0xff]  ;;  %v543_v58 = vmul.f32 %v1463_v1, %v320_v50  ;;  %v764_v63 = vadd.f32 %v1468_v5, %v541_v52 }
  0x99   : > { %963 = vst [vmem:[%s1491_s24 + $0x308] sm:$0xff] %v741_v56  ;;  %v322_v56 = vld [vmem:[%s1456_s4 + $0x3e0] sm:$0xff]  ;;  %v544_v61 = vmul.f32 %v1463_v1, %v321_v53  ;;  %v765_v3 = vadd.f32 %v1468_v5, %v542_v55 }
  0x9a   : > { %964 = vst [vmem:[%s1491_s24 + $0x310] sm:$0xff] %v742_v59  ;;  %v323_v59 = vld [vmem:[%s1456_s4 + $0x3e8] sm:$0xff]  ;;  %v545_v0 = vmul.f32 %v1463_v1, %v322_v56  ;;  %v766_v7 = vadd.f32 %v1468_v5, %v543_v58 }
  0x9b   : > { %965 = vst [vmem:[%s1491_s24 + $0x318] sm:$0xff] %v743_v62  ;;  %v324_v62 = vld [vmem:[%s1456_s4 + $0x3f0] sm:$0xff]  ;;  %v546_v4 = vmul.f32 %v1463_v1, %v323_v59  ;;  %v767_v10 = vadd.f32 %v1468_v5, %v544_v61 }
  0x9c   : > { %966 = vst [vmem:[%s1491_s24 + $0x320] sm:$0xff] %v744_v2  ;;  %v325_v2 = vld [vmem:[%s1456_s4 + $0x3f8] sm:$0xff]  ;;  %v547_v8 = vmul.f32 %v1463_v1, %v324_v62  ;;  %v768_v13 = vadd.f32 %v1468_v5, %v545_v0 }
  0x9d   : > { %967 = vst [vmem:[%s1491_s24 + $0x328] sm:$0xff] %v745_v6  ;;  %v326_v6 = vld [vmem:[%s1456_s4 + $0x400] sm:$0xff]  ;;  %v548_v11 = vmul.f32 %v1463_v1, %v325_v2  ;;  %v769_v16 = vadd.f32 %v1468_v5, %v546_v4 }
  0x9e   : > { %968 = vst [vmem:[%s1491_s24 + $0x330] sm:$0xff] %v746_v9  ;;  %v327_v9 = vld [vmem:[%s1456_s4 + $0x408] sm:$0xff]  ;;  %v549_v14 = vmul.f32 %v1463_v1, %v326_v6  ;;  %v770_v19 = vadd.f32 %v1468_v5, %v547_v8 }
  0x9f   : > { %969 = vst [vmem:[%s1491_s24 + $0x338] sm:$0xff] %v747_v12  ;;  %v328_v12 = vld [vmem:[%s1456_s4 + $0x410] sm:$0xff]  ;;  %v550_v17 = vmul.f32 %v1463_v1, %v327_v9  ;;  %v771_v22 = vadd.f32 %v1468_v5, %v548_v11 }
  0xa0   : > { %970 = vst [vmem:[%s1491_s24 + $0x340] sm:$0xff] %v748_v15  ;;  %v329_v15 = vld [vmem:[%s1456_s4 + $0x418] sm:$0xff]  ;;  %v551_v20 = vmul.f32 %v1463_v1, %v328_v12  ;;  %v772_v25 = vadd.f32 %v1468_v5, %v549_v14 }
  0xa1   : > { %971 = vst [vmem:[%s1491_s24 + $0x348] sm:$0xff] %v749_v18  ;;  %v330_v18 = vld [vmem:[%s1456_s4 + $0x420] sm:$0xff]  ;;  %v552_v23 = vmul.f32 %v1463_v1, %v329_v15  ;;  %v773_v28 = vadd.f32 %v1468_v5, %v550_v17 }
  0xa2   : > { %972 = vst [vmem:[%s1491_s24 + $0x350] sm:$0xff] %v750_v21  ;;  %v331_v21 = vld [vmem:[%s1456_s4 + $0x428] sm:$0xff]  ;;  %v553_v26 = vmul.f32 %v1463_v1, %v330_v18  ;;  %v774_v31 = vadd.f32 %v1468_v5, %v551_v20 }
  0xa3   : > { %973 = vst [vmem:[%s1491_s24 + $0x358] sm:$0xff] %v751_v24  ;;  %v332_v24 = vld [vmem:[%s1456_s4 + $0x430] sm:$0xff]  ;;  %v554_v29 = vmul.f32 %v1463_v1, %v331_v21  ;;  %v775_v34 = vadd.f32 %v1468_v5, %v552_v23 }
  0xa4   : > { %974 = vst [vmem:[%s1491_s24 + $0x360] sm:$0xff] %v752_v27  ;;  %v333_v27 = vld [vmem:[%s1456_s4 + $0x438] sm:$0xff]  ;;  %v555_v32 = vmul.f32 %v1463_v1, %v332_v24  ;;  %v776_v37 = vadd.f32 %v1468_v5, %v553_v26 }
  0xa5   : > { %975 = vst [vmem:[%s1491_s24 + $0x368] sm:$0xff] %v753_v30  ;;  %v334_v30 = vld [vmem:[%s1456_s4 + $0x440] sm:$0xff]  ;;  %v556_v35 = vmul.f32 %v1463_v1, %v333_v27  ;;  %v777_v40 = vadd.f32 %v1468_v5, %v554_v29 }
  0xa6   : > { %976 = vst [vmem:[%s1491_s24 + $0x370] sm:$0xff] %v754_v33  ;;  %v335_v33 = vld [vmem:[%s1456_s4 + $0x448] sm:$0xff]  ;;  %v557_v38 = vmul.f32 %v1463_v1, %v334_v30  ;;  %v778_v43 = vadd.f32 %v1468_v5, %v555_v32 }
  0xa7   : > { %977 = vst [vmem:[%s1491_s24 + $0x378] sm:$0xff] %v755_v36  ;;  %v336_v36 = vld [vmem:[%s1456_s4 + $0x450] sm:$0xff]  ;;  %v558_v41 = vmul.f32 %v1463_v1, %v335_v33  ;;  %v779_v46 = vadd.f32 %v1468_v5, %v556_v35 }
  0xa8   : > { %978 = vst [vmem:[%s1491_s24 + $0x380] sm:$0xff] %v756_v39  ;;  %v337_v39 = vld [vmem:[%s1456_s4 + $0x458] sm:$0xff]  ;;  %v559_v44 = vmul.f32 %v1463_v1, %v336_v36  ;;  %v780_v49 = vadd.f32 %v1468_v5, %v557_v38 }
  0xa9   : > { %979 = vst [vmem:[%s1491_s24 + $0x388] sm:$0xff] %v757_v42  ;;  %v338_v42 = vld [vmem:[%s1456_s4 + $0x460] sm:$0xff]  ;;  %v560_v47 = vmul.f32 %v1463_v1, %v337_v39  ;;  %v781_v52 = vadd.f32 %v1468_v5, %v558_v41 }
  0xaa   : > { %980 = vst [vmem:[%s1491_s24 + $0x390] sm:$0xff] %v758_v45  ;;  %v339_v45 = vld [vmem:[%s1456_s4 + $0x468] sm:$0xff]  ;;  %v561_v50 = vmul.f32 %v1463_v1, %v338_v42  ;;  %v782_v55 = vadd.f32 %v1468_v5, %v559_v44 }
  0xab   : > { %981 = vst [vmem:[%s1491_s24 + $0x398] sm:$0xff] %v759_v48  ;;  %v340_v48 = vld [vmem:[%s1456_s4 + $0x470] sm:$0xff]  ;;  %v562_v53 = vmul.f32 %v1463_v1, %v339_v45  ;;  %v783_v58 = vadd.f32 %v1468_v5, %v560_v47 }
  0xac   : > { %982 = vst [vmem:[%s1491_s24 + $0x3a0] sm:$0xff] %v760_v51  ;;  %v341_v51 = vld [vmem:[%s1456_s4 + $0x478] sm:$0xff]  ;;  %v563_v56 = vmul.f32 %v1463_v1, %v340_v48  ;;  %v784_v61 = vadd.f32 %v1468_v5, %v561_v50 }
  0xad   : > { %983 = vst [vmem:[%s1491_s24 + $0x3a8] sm:$0xff] %v761_v54  ;;  %v342_v54 = vld [vmem:[%s1456_s4 + $0x480] sm:$0xff]  ;;  %v564_v59 = vmul.f32 %v1463_v1, %v341_v51  ;;  %v785_v0 = vadd.f32 %v1468_v5, %v562_v53 }
  0xae   : > { %984 = vst [vmem:[%s1491_s24 + $0x3b0] sm:$0xff] %v762_v57  ;;  %v343_v57 = vld [vmem:[%s1456_s4 + $0x488] sm:$0xff]  ;;  %v565_v62 = vmul.f32 %v1463_v1, %v342_v54  ;;  %v786_v4 = vadd.f32 %v1468_v5, %v563_v56 }
  0xaf   : > { %985 = vst [vmem:[%s1491_s24 + $0x3b8] sm:$0xff] %v763_v60  ;;  %v344_v60 = vld [vmem:[%s1456_s4 + $0x490] sm:$0xff]  ;;  %v566_v2 = vmul.f32 %v1463_v1, %v343_v57  ;;  %v787_v8 = vadd.f32 %v1468_v5, %v564_v59 }
  0xb0   : > { %986 = vst [vmem:[%s1491_s24 + $0x3c0] sm:$0xff] %v764_v63  ;;  %v345_v63 = vld [vmem:[%s1456_s4 + $0x498] sm:$0xff]  ;;  %v567_v6 = vmul.f32 %v1463_v1, %v344_v60  ;;  %v788_v11 = vadd.f32 %v1468_v5, %v565_v62 }
  0xb1   : > { %987 = vst [vmem:[%s1491_s24 + $0x3c8] sm:$0xff] %v765_v3  ;;  %v346_v3 = vld [vmem:[%s1456_s4 + $0x4a0] sm:$0xff]  ;;  %v568_v9 = vmul.f32 %v1463_v1, %v345_v63  ;;  %v789_v14 = vadd.f32 %v1468_v5, %v566_v2 }
  0xb2   : > { %988 = vst [vmem:[%s1491_s24 + $0x3d0] sm:$0xff] %v766_v7  ;;  %v347_v7 = vld [vmem:[%s1456_s4 + $0x4a8] sm:$0xff]  ;;  %v569_v12 = vmul.f32 %v1463_v1, %v346_v3  ;;  %v790_v17 = vadd.f32 %v1468_v5, %v567_v6 }
  0xb3   : > { %989 = vst [vmem:[%s1491_s24 + $0x3d8] sm:$0xff] %v767_v10  ;;  %v348_v10 = vld [vmem:[%s1456_s4 + $0x4b0] sm:$0xff]  ;;  %v570_v15 = vmul.f32 %v1463_v1, %v347_v7  ;;  %v791_v20 = vadd.f32 %v1468_v5, %v568_v9 }
  0xb4   : > { %990 = vst [vmem:[%s1491_s24 + $0x3e0] sm:$0xff] %v768_v13  ;;  %v349_v13 = vld [vmem:[%s1456_s4 + $0x4b8] sm:$0xff]  ;;  %v571_v18 = vmul.f32 %v1463_v1, %v348_v10  ;;  %v792_v23 = vadd.f32 %v1468_v5, %v569_v12 }
  0xb5   : > { %991 = vst [vmem:[%s1491_s24 + $0x3e8] sm:$0xff] %v769_v16  ;;  %v350_v16 = vld [vmem:[%s1456_s4 + $0x4c0] sm:$0xff]  ;;  %v572_v21 = vmul.f32 %v1463_v1, %v349_v13  ;;  %v793_v26 = vadd.f32 %v1468_v5, %v570_v15 }
  0xb6   : > { %992 = vst [vmem:[%s1491_s24 + $0x3f0] sm:$0xff] %v770_v19  ;;  %v351_v19 = vld [vmem:[%s1456_s4 + $0x4c8] sm:$0xff]  ;;  %v573_v24 = vmul.f32 %v1463_v1, %v350_v16  ;;  %v794_v29 = vadd.f32 %v1468_v5, %v571_v18 }
  0xb7   : > { %993 = vst [vmem:[%s1491_s24 + $0x3f8] sm:$0xff] %v771_v22  ;;  %v352_v22 = vld [vmem:[%s1456_s4 + $0x4d0] sm:$0xff]  ;;  %v574_v27 = vmul.f32 %v1463_v1, %v351_v19  ;;  %v795_v32 = vadd.f32 %v1468_v5, %v572_v21 }
  0xb8   : > { %994 = vst [vmem:[%s1491_s24 + $0x400] sm:$0xff] %v772_v25  ;;  %v353_v25 = vld [vmem:[%s1456_s4 + $0x4d8] sm:$0xff]  ;;  %v575_v30 = vmul.f32 %v1463_v1, %v352_v22  ;;  %v796_v35 = vadd.f32 %v1468_v5, %v573_v24 }
  0xb9   : > { %995 = vst [vmem:[%s1491_s24 + $0x408] sm:$0xff] %v773_v28  ;;  %v354_v28 = vld [vmem:[%s1456_s4 + $0x4e0] sm:$0xff]  ;;  %v576_v33 = vmul.f32 %v1463_v1, %v353_v25  ;;  %v797_v38 = vadd.f32 %v1468_v5, %v574_v27 }
  0xba   : > { %996 = vst [vmem:[%s1491_s24 + $0x410] sm:$0xff] %v774_v31  ;;  %v355_v31 = vld [vmem:[%s1456_s4 + $0x4e8] sm:$0xff]  ;;  %v577_v36 = vmul.f32 %v1463_v1, %v354_v28  ;;  %v798_v41 = vadd.f32 %v1468_v5, %v575_v30 }
  0xbb   : > { %997 = vst [vmem:[%s1491_s24 + $0x418] sm:$0xff] %v775_v34  ;;  %v356_v34 = vld [vmem:[%s1456_s4 + $0x4f0] sm:$0xff]  ;;  %v578_v39 = vmul.f32 %v1463_v1, %v355_v31  ;;  %v799_v44 = vadd.f32 %v1468_v5, %v576_v33 }
  0xbc   : > { %998 = vst [vmem:[%s1491_s24 + $0x420] sm:$0xff] %v776_v37  ;;  %v357_v37 = vld [vmem:[%s1456_s4 + $0x4f8] sm:$0xff]  ;;  %v579_v42 = vmul.f32 %v1463_v1, %v356_v34  ;;  %v800_v47 = vadd.f32 %v1468_v5, %v577_v36 }
  0xbd   : > { %999 = vst [vmem:[%s1491_s24 + $0x428] sm:$0xff] %v777_v40  ;;  %v358_v40 = vld [vmem:[%s1456_s4 + $0x500] sm:$0xff]  ;;  %v580_v45 = vmul.f32 %v1463_v1, %v357_v37  ;;  %v801_v50 = vadd.f32 %v1468_v5, %v578_v39 }
  0xbe   : > { %1000 = vst [vmem:[%s1491_s24 + $0x430] sm:$0xff] %v778_v43  ;;  %v359_v43 = vld [vmem:[%s1456_s4 + $0x508] sm:$0xff]  ;;  %v581_v48 = vmul.f32 %v1463_v1, %v358_v40  ;;  %v802_v53 = vadd.f32 %v1468_v5, %v579_v42 }
  0xbf   : > { %1001 = vst [vmem:[%s1491_s24 + $0x438] sm:$0xff] %v779_v46  ;;  %v360_v46 = vld [vmem:[%s1456_s4 + $0x510] sm:$0xff]  ;;  %v582_v51 = vmul.f32 %v1463_v1, %v359_v43  ;;  %v803_v56 = vadd.f32 %v1468_v5, %v580_v45 }
  0xc0   : > { %1002 = vst [vmem:[%s1491_s24 + $0x440] sm:$0xff] %v780_v49  ;;  %v361_v49 = vld [vmem:[%s1456_s4 + $0x518] sm:$0xff]  ;;  %v583_v54 = vmul.f32 %v1463_v1, %v360_v46  ;;  %v804_v59 = vadd.f32 %v1468_v5, %v581_v48 }
  0xc1   : > { %1003 = vst [vmem:[%s1491_s24 + $0x448] sm:$0xff] %v781_v52  ;;  %v362_v52 = vld [vmem:[%s1456_s4 + $0x520] sm:$0xff]  ;;  %v584_v57 = vmul.f32 %v1463_v1, %v361_v49  ;;  %v805_v62 = vadd.f32 %v1468_v5, %v582_v51 }
  0xc2   : > { %1004 = vst [vmem:[%s1491_s24 + $0x450] sm:$0xff] %v782_v55  ;;  %v363_v55 = vld [vmem:[%s1456_s4 + $0x528] sm:$0xff]  ;;  %v585_v60 = vmul.f32 %v1463_v1, %v362_v52  ;;  %v806_v2 = vadd.f32 %v1468_v5, %v583_v54 }
  0xc3   : > { %1005 = vst [vmem:[%s1491_s24 + $0x458] sm:$0xff] %v783_v58  ;;  %v364_v58 = vld [vmem:[%s1456_s4 + $0x530] sm:$0xff]  ;;  %v586_v63 = vmul.f32 %v1463_v1, %v363_v55  ;;  %v807_v6 = vadd.f32 %v1468_v5, %v584_v57 }
  0xc4   : > { %1006 = vst [vmem:[%s1491_s24 + $0x460] sm:$0xff] %v784_v61  ;;  %v365_v61 = vld [vmem:[%s1456_s4 + $0x538] sm:$0xff]  ;;  %v587_v3 = vmul.f32 %v1463_v1, %v364_v58  ;;  %v808_v9 = vadd.f32 %v1468_v5, %v585_v60 }
  0xc5   : > { %1007 = vst [vmem:[%s1491_s24 + $0x468] sm:$0xff] %v785_v0  ;;  %v366_v0 = vld [vmem:[%s1456_s4 + $0x540] sm:$0xff]  ;;  %v588_v7 = vmul.f32 %v1463_v1, %v365_v61  ;;  %v809_v12 = vadd.f32 %v1468_v5, %v586_v63 }
  0xc6   : > { %1008 = vst [vmem:[%s1491_s24 + $0x470] sm:$0xff] %v786_v4  ;;  %v367_v4 = vld [vmem:[%s1456_s4 + $0x548] sm:$0xff]  ;;  %v589_v10 = vmul.f32 %v1463_v1, %v366_v0  ;;  %v810_v15 = vadd.f32 %v1468_v5, %v587_v3 }
  0xc7   : > { %1009 = vst [vmem:[%s1491_s24 + $0x478] sm:$0xff] %v787_v8  ;;  %v368_v8 = vld [vmem:[%s1456_s4 + $0x550] sm:$0xff]  ;;  %v590_v13 = vmul.f32 %v1463_v1, %v367_v4  ;;  %v811_v18 = vadd.f32 %v1468_v5, %v588_v7 }
  0xc8   : > { %1010 = vst [vmem:[%s1491_s24 + $0x480] sm:$0xff] %v788_v11  ;;  %v369_v11 = vld [vmem:[%s1456_s4 + $0x558] sm:$0xff]  ;;  %v591_v16 = vmul.f32 %v1463_v1, %v368_v8  ;;  %v812_v21 = vadd.f32 %v1468_v5, %v589_v10 }
  0xc9   : > { %1011 = vst [vmem:[%s1491_s24 + $0x488] sm:$0xff] %v789_v14  ;;  %v370_v14 = vld [vmem:[%s1456_s4 + $0x560] sm:$0xff]  ;;  %v592_v19 = vmul.f32 %v1463_v1, %v369_v11  ;;  %v813_v24 = vadd.f32 %v1468_v5, %v590_v13 }
  0xca   : > { %1012 = vst [vmem:[%s1491_s24 + $0x490] sm:$0xff] %v790_v17  ;;  %v371_v17 = vld [vmem:[%s1456_s4 + $0x568] sm:$0xff]  ;;  %v593_v22 = vmul.f32 %v1463_v1, %v370_v14  ;;  %v814_v27 = vadd.f32 %v1468_v5, %v591_v16 }
  0xcb   : > { %1013 = vst [vmem:[%s1491_s24 + $0x498] sm:$0xff] %v791_v20  ;;  %v372_v20 = vld [vmem:[%s1456_s4 + $0x570] sm:$0xff]  ;;  %v594_v25 = vmul.f32 %v1463_v1, %v371_v17  ;;  %v815_v30 = vadd.f32 %v1468_v5, %v592_v19 }
  0xcc   : > { %1014 = vst [vmem:[%s1491_s24 + $0x4a0] sm:$0xff] %v792_v23  ;;  %v373_v23 = vld [vmem:[%s1456_s4 + $0x578] sm:$0xff]  ;;  %v595_v28 = vmul.f32 %v1463_v1, %v372_v20  ;;  %v816_v33 = vadd.f32 %v1468_v5, %v593_v22 }
  0xcd   : > { %1015 = vst [vmem:[%s1491_s24 + $0x4a8] sm:$0xff] %v793_v26  ;;  %v374_v26 = vld [vmem:[%s1456_s4 + $0x580] sm:$0xff]  ;;  %v596_v31 = vmul.f32 %v1463_v1, %v373_v23  ;;  %v817_v36 = vadd.f32 %v1468_v5, %v594_v25 }
  0xce   : > { %1016 = vst [vmem:[%s1491_s24 + $0x4b0] sm:$0xff] %v794_v29  ;;  %v375_v29 = vld [vmem:[%s1456_s4 + $0x588] sm:$0xff]  ;;  %v597_v34 = vmul.f32 %v1463_v1, %v374_v26  ;;  %v818_v39 = vadd.f32 %v1468_v5, %v595_v28 }
  0xcf   : > { %1017 = vst [vmem:[%s1491_s24 + $0x4b8] sm:$0xff] %v795_v32  ;;  %v376_v32 = vld [vmem:[%s1456_s4 + $0x590] sm:$0xff]  ;;  %v598_v37 = vmul.f32 %v1463_v1, %v375_v29  ;;  %v819_v42 = vadd.f32 %v1468_v5, %v596_v31 }
  0xd0   : > { %1018 = vst [vmem:[%s1491_s24 + $0x4c0] sm:$0xff] %v796_v35  ;;  %v377_v35 = vld [vmem:[%s1456_s4 + $0x598] sm:$0xff]  ;;  %v599_v40 = vmul.f32 %v1463_v1, %v376_v32  ;;  %v820_v45 = vadd.f32 %v1468_v5, %v597_v34 }
  0xd1   : > { %1019 = vst [vmem:[%s1491_s24 + $0x4c8] sm:$0xff] %v797_v38  ;;  %v378_v38 = vld [vmem:[%s1456_s4 + $0x5a0] sm:$0xff]  ;;  %v600_v43 = vmul.f32 %v1463_v1, %v377_v35  ;;  %v821_v48 = vadd.f32 %v1468_v5, %v598_v37 }
  0xd2   : > { %1020 = vst [vmem:[%s1491_s24 + $0x4d0] sm:$0xff] %v798_v41  ;;  %v379_v41 = vld [vmem:[%s1456_s4 + $0x5a8] sm:$0xff]  ;;  %v601_v46 = vmul.f32 %v1463_v1, %v378_v38  ;;  %v822_v51 = vadd.f32 %v1468_v5, %v599_v40 }
  0xd3   : > { %1021 = vst [vmem:[%s1491_s24 + $0x4d8] sm:$0xff] %v799_v44  ;;  %v380_v44 = vld [vmem:[%s1456_s4 + $0x5b0] sm:$0xff]  ;;  %v602_v49 = vmul.f32 %v1463_v1, %v379_v41  ;;  %v823_v54 = vadd.f32 %v1468_v5, %v600_v43 }
  0xd4   : > { %1022 = vst [vmem:[%s1491_s24 + $0x4e0] sm:$0xff] %v800_v47  ;;  %v381_v47 = vld [vmem:[%s1456_s4 + $0x5b8] sm:$0xff]  ;;  %v603_v52 = vmul.f32 %v1463_v1, %v380_v44  ;;  %v824_v57 = vadd.f32 %v1468_v5, %v601_v46 }
  0xd5   : > { %1023 = vst [vmem:[%s1491_s24 + $0x4e8] sm:$0xff] %v801_v50  ;;  %v382_v50 = vld [vmem:[%s1456_s4 + $0x5c0] sm:$0xff]  ;;  %v604_v55 = vmul.f32 %v1463_v1, %v381_v47  ;;  %v825_v60 = vadd.f32 %v1468_v5, %v602_v49 }
  0xd6   : > { %1024 = vst [vmem:[%s1491_s24 + $0x4f0] sm:$0xff] %v802_v53  ;;  %v383_v53 = vld [vmem:[%s1456_s4 + $0x5c8] sm:$0xff]  ;;  %v605_v58 = vmul.f32 %v1463_v1, %v382_v50  ;;  %v826_v63 = vadd.f32 %v1468_v5, %v603_v52 }
  0xd7   : > { %1025 = vst [vmem:[%s1491_s24 + $0x4f8] sm:$0xff] %v803_v56  ;;  %v384_v56 = vld [vmem:[%s1456_s4 + $0x5d0] sm:$0xff]  ;;  %v606_v61 = vmul.f32 %v1463_v1, %v383_v53  ;;  %v827_v3 = vadd.f32 %v1468_v5, %v604_v55 }
  0xd8   : > { %1026 = vst [vmem:[%s1491_s24 + $0x500] sm:$0xff] %v804_v59  ;;  %v385_v59 = vld [vmem:[%s1456_s4 + $0x5d8] sm:$0xff]  ;;  %v607_v0 = vmul.f32 %v1463_v1, %v384_v56  ;;  %v828_v7 = vadd.f32 %v1468_v5, %v605_v58 }
  0xd9   : > { %1027 = vst [vmem:[%s1491_s24 + $0x508] sm:$0xff] %v805_v62  ;;  %v386_v62 = vld [vmem:[%s1456_s4 + $0x5e0] sm:$0xff]  ;;  %v608_v4 = vmul.f32 %v1463_v1, %v385_v59  ;;  %v829_v10 = vadd.f32 %v1468_v5, %v606_v61 }
  0xda   : > { %1028 = vst [vmem:[%s1491_s24 + $0x510] sm:$0xff] %v806_v2  ;;  %v387_v2 = vld [vmem:[%s1456_s4 + $0x5e8] sm:$0xff]  ;;  %v609_v8 = vmul.f32 %v1463_v1, %v386_v62  ;;  %v830_v13 = vadd.f32 %v1468_v5, %v607_v0 }
  0xdb   : > { %1029 = vst [vmem:[%s1491_s24 + $0x518] sm:$0xff] %v807_v6  ;;  %v388_v6 = vld [vmem:[%s1456_s4 + $0x5f0] sm:$0xff]  ;;  %v610_v11 = vmul.f32 %v1463_v1, %v387_v2  ;;  %v831_v16 = vadd.f32 %v1468_v5, %v608_v4 }
  0xdc   : > { %1030 = vst [vmem:[%s1491_s24 + $0x520] sm:$0xff] %v808_v9  ;;  %v389_v9 = vld [vmem:[%s1456_s4 + $0x5f8] sm:$0xff]  ;;  %v611_v14 = vmul.f32 %v1463_v1, %v388_v6  ;;  %v832_v19 = vadd.f32 %v1468_v5, %v609_v8 }
  0xdd   : > { %1031 = vst [vmem:[%s1491_s24 + $0x528] sm:$0xff] %v809_v12  ;;  %v390_v12 = vld [vmem:[%s1456_s4 + $0x600] sm:$0xff]  ;;  %v612_v17 = vmul.f32 %v1463_v1, %v389_v9  ;;  %v833_v22 = vadd.f32 %v1468_v5, %v610_v11 }
  0xde   : > { %1032 = vst [vmem:[%s1491_s24 + $0x530] sm:$0xff] %v810_v15  ;;  %v391_v15 = vld [vmem:[%s1456_s4 + $0x608] sm:$0xff]  ;;  %v613_v20 = vmul.f32 %v1463_v1, %v390_v12  ;;  %v834_v25 = vadd.f32 %v1468_v5, %v611_v14 }
  0xdf   : > { %1033 = vst [vmem:[%s1491_s24 + $0x538] sm:$0xff] %v811_v18  ;;  %v392_v18 = vld [vmem:[%s1456_s4 + $0x610] sm:$0xff]  ;;  %v614_v23 = vmul.f32 %v1463_v1, %v391_v15  ;;  %v835_v28 = vadd.f32 %v1468_v5, %v612_v17 }
  0xe0   : > { %1034 = vst [vmem:[%s1491_s24 + $0x540] sm:$0xff] %v812_v21  ;;  %v393_v21 = vld [vmem:[%s1456_s4 + $0x618] sm:$0xff]  ;;  %v615_v26 = vmul.f32 %v1463_v1, %v392_v18  ;;  %v836_v31 = vadd.f32 %v1468_v5, %v613_v20 }
  0xe1   : > { %1035 = vst [vmem:[%s1491_s24 + $0x548] sm:$0xff] %v813_v24  ;;  %v394_v24 = vld [vmem:[%s1456_s4 + $0x620] sm:$0xff]  ;;  %v616_v29 = vmul.f32 %v1463_v1, %v393_v21  ;;  %v837_v34 = vadd.f32 %v1468_v5, %v614_v23 }
  0xe2   : > { %1036 = vst [vmem:[%s1491_s24 + $0x550] sm:$0xff] %v814_v27  ;;  %v395_v27 = vld [vmem:[%s1456_s4 + $0x628] sm:$0xff]  ;;  %v617_v32 = vmul.f32 %v1463_v1, %v394_v24  ;;  %v838_v37 = vadd.f32 %v1468_v5, %v615_v26 }
  0xe3   : > { %1037 = vst [vmem:[%s1491_s24 + $0x558] sm:$0xff] %v815_v30  ;;  %v396_v30 = vld [vmem:[%s1456_s4 + $0x630] sm:$0xff]  ;;  %v618_v35 = vmul.f32 %v1463_v1, %v395_v27  ;;  %v839_v40 = vadd.f32 %v1468_v5, %v616_v29 }
  0xe4   : > { %1038 = vst [vmem:[%s1491_s24 + $0x560] sm:$0xff] %v816_v33  ;;  %v397_v33 = vld [vmem:[%s1456_s4 + $0x638] sm:$0xff]  ;;  %v619_v38 = vmul.f32 %v1463_v1, %v396_v30  ;;  %v840_v43 = vadd.f32 %v1468_v5, %v617_v32 }
  0xe5   : > { %1039 = vst [vmem:[%s1491_s24 + $0x568] sm:$0xff] %v817_v36  ;;  %v398_v36 = vld [vmem:[%s1456_s4 + $0x640] sm:$0xff]  ;;  %v620_v41 = vmul.f32 %v1463_v1, %v397_v33  ;;  %v841_v46 = vadd.f32 %v1468_v5, %v618_v35 }
  0xe6   : > { %1040 = vst [vmem:[%s1491_s24 + $0x570] sm:$0xff] %v818_v39  ;;  %v399_v39 = vld [vmem:[%s1456_s4 + $0x648] sm:$0xff]  ;;  %v621_v44 = vmul.f32 %v1463_v1, %v398_v36  ;;  %v842_v49 = vadd.f32 %v1468_v5, %v619_v38 }
  0xe7   : > { %1041 = vst [vmem:[%s1491_s24 + $0x578] sm:$0xff] %v819_v42  ;;  %v400_v42 = vld [vmem:[%s1456_s4 + $0x650] sm:$0xff]  ;;  %v622_v47 = vmul.f32 %v1463_v1, %v399_v39  ;;  %v843_v52 = vadd.f32 %v1468_v5, %v620_v41 }
  0xe8   : > { %1042 = vst [vmem:[%s1491_s24 + $0x580] sm:$0xff] %v820_v45  ;;  %v401_v45 = vld [vmem:[%s1456_s4 + $0x658] sm:$0xff]  ;;  %v623_v50 = vmul.f32 %v1463_v1, %v400_v42  ;;  %v844_v55 = vadd.f32 %v1468_v5, %v621_v44 }
  0xe9   : > { %1043 = vst [vmem:[%s1491_s24 + $0x588] sm:$0xff] %v821_v48  ;;  %v402_v48 = vld [vmem:[%s1456_s4 + $0x660] sm:$0xff]  ;;  %v624_v53 = vmul.f32 %v1463_v1, %v401_v45  ;;  %v845_v58 = vadd.f32 %v1468_v5, %v622_v47 }
  0xea   : > { %1044 = vst [vmem:[%s1491_s24 + $0x590] sm:$0xff] %v822_v51  ;;  %v403_v51 = vld [vmem:[%s1456_s4 + $0x668] sm:$0xff]  ;;  %v625_v56 = vmul.f32 %v1463_v1, %v402_v48  ;;  %v846_v61 = vadd.f32 %v1468_v5, %v623_v50 }
  0xeb   : > { %1045 = vst [vmem:[%s1491_s24 + $0x598] sm:$0xff] %v823_v54  ;;  %v404_v54 = vld [vmem:[%s1456_s4 + $0x670] sm:$0xff]  ;;  %v626_v59 = vmul.f32 %v1463_v1, %v403_v51  ;;  %v847_v0 = vadd.f32 %v1468_v5, %v624_v53 }
  0xec   : > { %1046 = vst [vmem:[%s1491_s24 + $0x5a0] sm:$0xff] %v824_v57  ;;  %v405_v57 = vld [vmem:[%s1456_s4 + $0x678] sm:$0xff]  ;;  %v627_v62 = vmul.f32 %v1463_v1, %v404_v54  ;;  %v848_v4 = vadd.f32 %v1468_v5, %v625_v56 }
  0xed   : > { %1047 = vst [vmem:[%s1491_s24 + $0x5a8] sm:$0xff] %v825_v60  ;;  %v406_v60 = vld [vmem:[%s1456_s4 + $0x680] sm:$0xff]  ;;  %v628_v2 = vmul.f32 %v1463_v1, %v405_v57  ;;  %v849_v8 = vadd.f32 %v1468_v5, %v626_v59 }
  0xee   : > { %1048 = vst [vmem:[%s1491_s24 + $0x5b0] sm:$0xff] %v826_v63  ;;  %v407_v63 = vld [vmem:[%s1456_s4 + $0x688] sm:$0xff]  ;;  %v629_v6 = vmul.f32 %v1463_v1, %v406_v60  ;;  %v850_v11 = vadd.f32 %v1468_v5, %v627_v62 }
  0xef   : > { %1049 = vst [vmem:[%s1491_s24 + $0x5b8] sm:$0xff] %v827_v3  ;;  %v408_v3 = vld [vmem:[%s1456_s4 + $0x690] sm:$0xff]  ;;  %v630_v9 = vmul.f32 %v1463_v1, %v407_v63  ;;  %v851_v14 = vadd.f32 %v1468_v5, %v628_v2 }
  0xf0   : > { %1050 = vst [vmem:[%s1491_s24 + $0x5c0] sm:$0xff] %v828_v7  ;;  %v409_v7 = vld [vmem:[%s1456_s4 + $0x698] sm:$0xff]  ;;  %v631_v12 = vmul.f32 %v1463_v1, %v408_v3  ;;  %v852_v17 = vadd.f32 %v1468_v5, %v629_v6 }
  0xf1   : > { %1051 = vst [vmem:[%s1491_s24 + $0x5c8] sm:$0xff] %v829_v10  ;;  %v410_v10 = vld [vmem:[%s1456_s4 + $0x6a0] sm:$0xff]  ;;  %v632_v15 = vmul.f32 %v1463_v1, %v409_v7  ;;  %v853_v20 = vadd.f32 %v1468_v5, %v630_v9 }
  0xf2   : > { %1052 = vst [vmem:[%s1491_s24 + $0x5d0] sm:$0xff] %v830_v13  ;;  %v411_v13 = vld [vmem:[%s1456_s4 + $0x6a8] sm:$0xff]  ;;  %v633_v18 = vmul.f32 %v1463_v1, %v410_v10  ;;  %v854_v23 = vadd.f32 %v1468_v5, %v631_v12 }
  0xf3   : > { %1053 = vst [vmem:[%s1491_s24 + $0x5d8] sm:$0xff] %v831_v16  ;;  %v412_v16 = vld [vmem:[%s1456_s4 + $0x6b0] sm:$0xff]  ;;  %v634_v21 = vmul.f32 %v1463_v1, %v411_v13  ;;  %v855_v26 = vadd.f32 %v1468_v5, %v632_v15 }
  0xf4   : > { %1054 = vst [vmem:[%s1491_s24 + $0x5e0] sm:$0xff] %v832_v19  ;;  %v413_v19 = vld [vmem:[%s1456_s4 + $0x6b8] sm:$0xff]  ;;  %v635_v24 = vmul.f32 %v1463_v1, %v412_v16  ;;  %v856_v29 = vadd.f32 %v1468_v5, %v633_v18 }
  0xf5   : > { %1055 = vst [vmem:[%s1491_s24 + $0x5e8] sm:$0xff] %v833_v22  ;;  %v414_v22 = vld [vmem:[%s1456_s4 + $0x6c0] sm:$0xff]  ;;  %v636_v27 = vmul.f32 %v1463_v1, %v413_v19  ;;  %v857_v32 = vadd.f32 %v1468_v5, %v634_v21 }
  0xf6   : > { %1056 = vst [vmem:[%s1491_s24 + $0x5f0] sm:$0xff] %v834_v25  ;;  %v415_v25 = vld [vmem:[%s1456_s4 + $0x6c8] sm:$0xff]  ;;  %v637_v30 = vmul.f32 %v1463_v1, %v414_v22  ;;  %v858_v35 = vadd.f32 %v1468_v5, %v635_v24 }
  0xf7   : > { %1057 = vst [vmem:[%s1491_s24 + $0x5f8] sm:$0xff] %v835_v28  ;;  %v416_v28 = vld [vmem:[%s1456_s4 + $0x6d0] sm:$0xff]  ;;  %v638_v33 = vmul.f32 %v1463_v1, %v415_v25  ;;  %v859_v38 = vadd.f32 %v1468_v5, %v636_v27 }
  0xf8   : > { %1058 = vst [vmem:[%s1491_s24 + $0x600] sm:$0xff] %v836_v31  ;;  %v417_v31 = vld [vmem:[%s1456_s4 + $0x6d8] sm:$0xff]  ;;  %v639_v36 = vmul.f32 %v1463_v1, %v416_v28 }
  0xf9   : > { %1059 = vst [vmem:[%s1491_s24 + $0x608] sm:$0xff] %v837_v34  ;;  %v418_v34 = vld [vmem:[%s1456_s4 + $0x6e0] sm:$0xff]  ;;  %v640_v39 = vmul.f32 %v1463_v1, %v417_v31  ;;  %v861_v42 = vadd.f32 %v1468_v5, %v638_v33 }
  0xfa   : > { %1060 = vst [vmem:[%s1491_s24 + $0x610] sm:$0xff] %v838_v37  ;;  %v419_v37 = vld [vmem:[%s1456_s4 + $0x6e8] sm:$0xff]  ;;  %v641_v41 = vmul.f32 %v1463_v1, %v418_v34  ;;  %v862_v44 = vadd.f32 %v1468_v5, %v639_v36 }
  0xfb   : > { %1061 = vst [vmem:[%s1491_s24 + $0x618] sm:$0xff] %v839_v40  ;;  %v860_v40 = vadd.f32 %v1468_v5, %v637_v30  ;;  %v863_v45 = vadd.f32 %v1468_v5, %v640_v39 }
  0xfc   : > { %1062 = vst [vmem:[%s1491_s24 + $0x620] sm:$0xff] %v840_v43  ;;  %v642_v43 = vmul.f32 %v1463_v1, %v419_v37 }
  0xfd   : > { %1063 = vst [vmem:[%s1491_s24 + $0x628] sm:$0xff] %v841_v46  ;;  %v864_v46 = vadd.f32 %v1468_v5, %v641_v41 }
  0xfe   : > { %1064 = vst [vmem:[%s1491_s24 + $0x630] sm:$0xff] %v842_v49  ;;  %v865_v47 = vadd.f32 %v1468_v5, %v642_v43 }
  0xff   : > { %1065 = vst [vmem:[%s1491_s24 + $0x638] sm:$0xff] %v843_v52 }
 0x100   : > { %1066 = vst [vmem:[%s1491_s24 + $0x640] sm:$0xff] %v844_v55 }
 0x101   : > { %1067 = vst [vmem:[%s1491_s24 + $0x648] sm:$0xff] %v845_v58 }
 0x102   : > { %1068 = vst [vmem:[%s1491_s24 + $0x650] sm:$0xff] %v846_v61 }
 0x103   : > { %1069 = vst [vmem:[%s1491_s24 + $0x658] sm:$0xff] %v847_v0 }
 0x104   : > { %1070 = vst [vmem:[%s1491_s24 + $0x660] sm:$0xff] %v848_v4 }
 0x105   : > { %1071 = vst [vmem:[%s1491_s24 + $0x668] sm:$0xff] %v849_v8 }
 0x106   : > { %1072 = vst [vmem:[%s1491_s24 + $0x670] sm:$0xff] %v850_v11 }
 0x107   : > { %1073 = vst [vmem:[%s1491_s24 + $0x678] sm:$0xff] %v851_v14 }
 0x108   : > { %1074 = vst [vmem:[%s1491_s24 + $0x680] sm:$0xff] %v852_v17 }
 0x109   : > { %1075 = vst [vmem:[%s1491_s24 + $0x688] sm:$0xff] %v853_v20 }
 0x10a   : > { %1076 = vst [vmem:[%s1491_s24 + $0x690] sm:$0xff] %v854_v23 }
 0x10b   : > { %1077 = vst [vmem:[%s1491_s24 + $0x698] sm:$0xff] %v855_v26 }
 0x10c   : > { %1078 = vst [vmem:[%s1491_s24 + $0x6a0] sm:$0xff] %v856_v29 }
 0x10d   : > { %1079 = vst [vmem:[%s1491_s24 + $0x6a8] sm:$0xff] %v857_v32 }
 0x10e   : > { %1080 = vst [vmem:[%s1491_s24 + $0x6b0] sm:$0xff] %v858_v35 }
 0x10f   : > { %1081 = vst [vmem:[%s1491_s24 + $0x6b8] sm:$0xff] %v859_v38 }
 0x110   : > { %1082 = vst [vmem:[%s1491_s24 + $0x6c0] sm:$0xff] %v860_v40 }
 0x111   : > { %1083 = vst [vmem:[%s1491_s24 + $0x6c8] sm:$0xff] %v861_v42 }
 0x112   : > { %1084 = vst [vmem:[%s1491_s24 + $0x6d0] sm:$0xff] %v862_v44 }
 0x113   : > { %1085 = vst [vmem:[%s1491_s24 + $0x6d8] sm:$0xff] %v863_v45 }
 0x114   : > { %1086 = vst [vmem:[%s1491_s24 + $0x6e0] sm:$0xff] %v864_v46 }
 0x115   : > { %1087 = vst [vmem:[%s1491_s24 + $0x6e8] sm:$0xff] %v865_v47 }
 0x116   : > { %1303 = shalt.err (!%p1300_p7)
}
 0x117   : > { %s1346_s28 = smov 256   ;;  %s1347_s29 = smov 16  }
 0x118   : > { %1198 = dma.vmem_to_hbm [thread:$0]  (%p1420_p11), %s1103_s10, 28416, %s1105_s11, %s1089_s12, %s1346_s28, %s1346_s28, %s1347_s29  }
 0x119 PF: > { %s1119_s30 = sand.u32 1, %s1330_s16   ;;  %p1205_p8 = pnand %p1180_p9, %p1424_p12 }
 0x11a   : > { %s1120_s4 = scalar_lea.sflag [#allocation6], %s1119_s30 }
 0x11b   : > { %p1206_p10 = pneg %p1205_p8 }
 0x11d   : > { %1325 = dma.done.wait (%p1206_p10), %s1120_s4, 28416  }
 0x11e   : > { %1327 = vsyncadd (%p1206_p10), %s1120_s4, 4294938880  ;;  %p18_p0 = scmp.ge.s32.totalorder %s1399_s20, 4   ;;  %s2400_s16 = smov %s1334_s17 }
 0x11f   : > { %s2401_s17 = smov %s1338_s18  ;;  %s2402_s18 = smov %s1411_s23 }
 0x120   : > { %s2403_s19 = smov %s1399_s20  ;;  %20 = sbr.rel (!%p18_p0) target bundleno = 8 (0x8), region = 77 }
 0x125   :  { %1126 = vsyncpa [#allocation5], 1 }
 0x126   :  { %1128 = vsyncpa [#allocation5 + $0x1], 1 }
 0x127   :  { %1129 = vsyncpa [#allocation6], 1 }
 0x128   :  { %1131 = vsyncpa [#allocation6 + $0x1], 1 }

</bundles_post_ra>
